<compile_context>
chip_gen: v7x
topology: tpu7x:2x2x1
jax: 0.10.0
libtpu: 0.0.40
codegen_flags: <defaults>
</compile_context>

<pallas_src>
import functools

import jax
import jax.numpy as jnp
from jax.experimental import pallas as pl
from jax.experimental.pallas import tpu as pltpu

LANE = 128  # vreg lane width: each pair's bin block is padded to this


# ---------------------------------------------------------------------------
# Pallas kernel: LayerNorm (stats only) + bf16 Linear + softmax-CE + masked sum
# ---------------------------------------------------------------------------
def pair_loss_kernel(x_ref, w_ref, b_ref, lm_ref, out_ref, acc_ref, *,
                     num_pairs, nb_pad, eps, m_total, tm, tiles_per_split,
                     split_grid):
    if split_grid:
        j = pl.program_id(1)
        nj = pl.num_programs(1)
        gtile = pl.program_id(0) * tiles_per_split + j   # logical (unclamped) tile
    else:
        j = pl.program_id(0)
        nj = pl.num_programs(0)
        gtile = j

    @pl.when(j == 0)
    def _():
        acc_ref[...] = jnp.zeros_like(acc_ref)

    # LayerNorm statistics in f32 (affine folded into W / bias in the wrapper).
    x = x_ref[...].astype(jnp.float32)                       # (TM, C)
    mu = jnp.mean(x, axis=-1, keepdims=True)
    xc = x - mu
    var = jnp.mean(xc * xc, axis=-1, keepdims=True)
    xn = (xc * jax.lax.rsqrt(var + eps)).astype(jnp.bfloat16)

    # Linear on the MXU: bf16 operands, f32 accumulation.  Padded (fake) bins
    # have zero weight columns and -1e30 bias -> contribute 0 to the softmax.
    logits = jnp.dot(xn, w_ref[...], preferred_element_type=jnp.float32)
    logits = logits + b_ref[...]                             # (TM, P*nb_pad)

    lm = lm_ref[...].astype(jnp.float32)                     # (TM, 2P): [labels | mask]

    # Hoisted out of the pair loop (JAX does not CSE broadcast_in_dim).
    bins_iota = jax.lax.broadcasted_iota(
        jnp.int32, (tm, nb_pad), 1).astype(jnp.float32)
    row_ids = jax.lax.broadcasted_iota(jnp.int32, (tm, 1), 0)
    # Ragged-tail / dead-step mask: rows at/after M contribute exactly 0.
    # (jnp.where is a lane select, so garbage/NaN in invalid rows is discarded.)
    row_valid = (gtile * tm + row_ids) < m_total

    row_loss = jnp.zeros((tm, 1), jnp.float32)
    for p in range(num_pairs):                               # small static unroll (P=2)
        lg = logits[:, p * nb_pad:(p + 1) * nb_pad]          # lane-aligned (TM, 128)
        mx = jnp.max(lg, axis=-1, keepdims=True)
        lgs = lg - mx                                        # shifted logits, only live temp
        se = jnp.sum(jnp.exp(lgs), axis=-1, keepdims=True)
        picked = jnp.sum(jnp.where(bins_iota == lm[:, p:p + 1], lgs, 0.0),
                         axis=-1, keepdims=True)
        row_loss = row_loss + lm[:, num_pairs + p:num_pairs + p + 1] * (
            jnp.log(se) - picked)                            # == lse - logit[label]

    # Vector-shaped accumulator: no scalar reduce / (1,1) store per grid step.
    acc_ref[...] = acc_ref[...] + jnp.where(row_valid, row_loss, 0.0)

    @pl.when(j == nj - 1)
    def _():
        total = jnp.sum(acc_ref[...])
        out_ref[...] = jnp.broadcast_to(total, out_ref.shape)  # lane-dense block


# ---------------------------------------------------------------------------
# Wrapper: glue (cdist / masks / labels / param folding) + pallas_call
# ---------------------------------------------------------------------------
def pair_dist_loss(pair_state, atom_coords, atom_masks, pair_mask,
                   gamma, beta, w_t, bias, atom_pairs,
                   *, d_min=2.5, d_max=20.0, step=0.25, eps=1e-5,
                   tm=1024, num_splits=None):
    B, N, _, C = pair_state.shape
    P = len(atom_pairs)
    OUT = w_t.shape[-1]
    NB = OUT // P
    NBP = max(LANE, int(pl.cdiv(NB, LANE)) * LANE)           # lane-aligned bins/pair
    OUTP = P * NBP

    # ---- glue (matches the torch no_grad block): pairwise distances + masks
    dists, masks = [], []
    for a1, a2 in atom_pairs:
        c1, c2 = atom_coords[a1], atom_coords[a2]
        diff = c1[:, :, None, :] - c2[:, None, :, :]
        dists.append(jnp.sqrt(jnp.sum(diff * diff, axis=-1)))  # cdist, p=2
        mm = jnp.logical_and(atom_masks[a1][:, :, None], atom_masks[a2][:, None, :])
        if pair_mask is not None:
            mm = jnp.logical_and(mm, pair_mask)
        masks.append(mm)
    full_dists = jnp.stack(dists, axis=-1)                   # (B, N, N, P)
    full_mask = jnp.stack(masks, axis=-1)                    # (B, N, N, P) bool

    # Labels precomputed with plain XLA (same semantics as to_labels()).
    dc = jnp.clip(full_dists, d_min, d_max + step) - d_min
    labels = jnp.round(dc / step)                            # exact small ints
    mask_f = full_mask.astype(jnp.float32)
    mask_sum = jnp.sum(mask_f)                               # counted outside kernel

    # Fold LayerNorm affine into the linear; pad bins to 128 lanes; bf16 weight.
    w_eff = (gamma[:, None] * w_t).reshape(C, P, NB)
    b_eff = (beta @ w_t + bias).reshape(P, NB)
    w_pad = jnp.pad(w_eff, ((0, 0), (0, 0), (0, NBP - NB))
                    ).reshape(C, OUTP).astype(jnp.bfloat16)
    b_pad = jnp.pad(b_eff, ((0, 0), (0, NBP - NB)),
                    constant_values=-1e30).reshape(1, OUTP).astype(jnp.float32)

    # ---- generation-aware core split: 2 only on v7x (2 TCs/chip), else 1.
    if num_splits is None:
        kind = jax.devices()[0].device_kind.lower()
        num_splits = 2 if ("v7" in kind or "7x" in kind) else 1

    # ---- row layout: native-dtype rows, no astype / no pad; ragged tail is
    #      masked in-kernel.  Labels|mask stream shipped as bf16 (values exact).
    M = B * N * N
    x = pair_state.reshape(M, C)                             # native dtype, no copy
    lm = jnp.concatenate([labels.reshape(M, P), mask_f.reshape(M, P)],
                         axis=-1).astype(jnp.bfloat16)

    rows_per_split = int(pl.cdiv(M, num_splits))
    tm_eff = int(min(tm, int(pl.cdiv(rows_per_split, 16)) * 16))  # 16-aligned rows
    total_tiles = int(pl.cdiv(M, tm_eff))
    tiles_per_split = int(pl.cdiv(total_tiles, num_splits))

    kernel = functools.partial(
        pair_loss_kernel, num_pairs=P, nb_pad=NBP, eps=eps, m_total=M,
        tm=tm_eff, tiles_per_split=tiles_per_split, split_grid=(num_splits > 1))

    if num_splits == 1:
        grid = (total_tiles,)
        row_map = lambda j: (j, 0)
        const_map = lambda j: (0, 0)
        out_map = lambda j: (0, 0, 0)
        dims = ("arbitrary",)
    else:
        grid = (num_splits, tiles_per_split)
        last_tile = total_tiles - 1
        # Dead steps (when tiles don't split evenly) re-point at the last real
        # tile; their rows fail the in-kernel row_valid test and contribute 0.
        row_map = lambda c, j: (jnp.minimum(c * tiles_per_split + j, last_tile), 0)
        const_map = lambda c, j: (0, 0)
        out_map = lambda c, j: (c, 0, 0)
        dims = (pltpu.CORE_PARALLEL, pltpu.ARBITRARY)        # real per-TC split on v7x

    partials = pl.pallas_call(
        kernel,
        out_shape=jax.ShapeDtypeStruct((num_splits, 8, LANE), jnp.float32),
        grid_spec=pltpu.PrefetchScalarGridSpec(
            num_scalar_prefetch=0,
            grid=grid,
            in_specs=[
                pl.BlockSpec((tm_eff, C), row_map),          # activations (native dtype)
                pl.BlockSpec((C, OUTP), const_map),          # bf16 folded weight
                pl.BlockSpec((1, OUTP), const_map),          # f32 bias (-1e30 pad)
                pl.BlockSpec((tm_eff, 2 * P), row_map),      # bf16 labels|mask
            ],
            out_specs=pl.BlockSpec((1, 8, LANE), out_map),
            scratch_shapes=[pltpu.VMEM((tm_eff, 1), jnp.float32)],
        ),
        compiler_params=pltpu.CompilerParams(dimension_semantics=dims),
    )(x, w_pad, b_pad, lm)

    loss_sum = jnp.sum(partials[:, 0, 0])
    # mean over masked entries; guard against an all-False mask.
    return loss_sum / jnp.maximum(mask_sum, 1.0)


# ---------------------------------------------------------------------------
# Pure-JAX reference (f32 end-to-end) for a sanity check
# ---------------------------------------------------------------------------
def reference_loss(pair_state, atom_coords, atom_masks, pair_mask,
                   gamma, beta, w_t, bias, atom_pairs,
                   d_min=2.5, d_max=20.0, step=0.25, eps=1e-5):
    B, N, _, C = pair_state.shape
    P = len(atom_pairs)
    NB = w_t.shape[-1] // P
    dists, masks = [], []
    for a1, a2 in atom_pairs:
        c1, c2 = atom_coords[a1], atom_coords[a2]
        diff = c1[:, :, None, :] - c2[:, None, :, :]
        dists.append(jnp.sqrt(jnp.sum(diff * diff, axis=-1)))
        mm = jnp.logical_and(atom_masks[a1][:, :, None], atom_masks[a2][:, None, :])
        if pair_mask is not None:
            mm = jnp.logical_and(mm, pair_mask)
        masks.append(mm)
    d = jnp.stack(dists, -1)
    m = jnp.stack(masks, -1).astype(jnp.float32)
    x = pair_state.astype(jnp.float32)
    mu = x.mean(-1, keepdims=True)
    var = ((x - mu) ** 2).mean(-1, keepdims=True)
    xn = (x - mu) / jnp.sqrt(var + eps) * gamma + beta
    logits = (xn @ w_t + bias).reshape(B, N, N, P, NB)
    dc = jnp.clip(d, d_min, d_max + step) - d_min
    lbl = jnp.round(dc / step).astype(jnp.int32)
    lse = jax.scipy.special.logsumexp(logits, axis=-1)
    picked = jnp.take_along_axis(logits, lbl[..., None], axis=-1)[..., 0]
    ce = lse - picked
    return jnp.sum(ce * m) / jnp.sum(m)


if __name__ == "__main__":
    # Module hyperparams
    D_MIN, D_MAX, STEP = 2.5, 20.0, 0.25
    NUM_BINS = int(round((D_MAX + 2 * STEP - D_MIN) / STEP))   # 72 == len(arange(2.5, 20.5, 0.25))
    atom_pairs = [("N", "CA"), ("CA", "C")]
    P = len(atom_pairs)

    B, N, DIM_IN = 2, 8, 32
    OUT = P * NUM_BINS                                         # 144

    key = jax.random.PRNGKey(0)
    k1, k2, k3, k4, k5, k6, k7 = jax.random.split(key, 7)

    pair_state = jax.random.normal(k1, (B, N, N, DIM_IN), jnp.float32)
    atom_coords = {
        "N": 5.0 * jax.random.normal(k2, (B, N, 3), jnp.float32),
        "CA": 5.0 * jax.random.normal(k3, (B, N, 3), jnp.float32),
        "C": 5.0 * jax.random.normal(k4, (B, N, 3), jnp.float32),
    }
    atom_masks = {
        "N": jax.random.uniform(k5, (B, N)) > 0.2,
        "CA": jax.random.uniform(k6, (B, N)) > 0.2,
        "C": jnp.ones((B, N), jnp.bool_),
    }
    pair_mask = jax.random.uniform(k7, (B, N, N)) > 0.1

    # LayerNorm(dim_in) + Linear(dim_in, P*NUM_BINS) parameters (non-trivial
    # gamma/beta so the affine fold is actually exercised).
    kw, kb, kg, kbe = jax.random.split(jax.random.PRNGKey(42), 4)
    gamma = 1.0 + 0.1 * jax.random.normal(kg, (DIM_IN,), jnp.float32)
    beta = 0.05 * jax.random.normal(kbe, (DIM_IN,), jnp.float32)
    w_t = 0.02 * jax.random.normal(kw, (DIM_IN, OUT), jnp.float32)  # stored (in, out)
    bias = 0.01 * jax.random.normal(kb, (OUT,), jnp.float32)

    loss = pair_dist_loss(pair_state, atom_coords, atom_masks, pair_mask,
                          gamma, beta, w_t, bias, atom_pairs,
                          d_min=D_MIN, d_max=D_MAX, step=STEP)
    loss = jax.block_until_ready(loss)

    ref = reference_loss(pair_state, atom_coords, atom_masks, pair_mask,
                         gamma, beta, w_t, bias, atom_pairs,
                         d_min=D_MIN, d_max=D_MAX, step=STEP)
    assert jnp.isfinite(loss), "loss is not finite"
    # bf16 MXU operands (f32 accumulation) -> allow a small tolerance vs f32 ref
    assert abs(float(loss) - float(ref)) < 5e-3, (float(loss), float(ref))

    print("KERNEL_OK")
</pallas_src>

<mosaic_0001>
module attributes {stable_mosaic.version = 11 : i64} {
  func.func @pair_loss_kernel(%arg0: i32, %arg1: memref<128x32xf32, #tpu.memory_space<vmem>>, %arg2: memref<32x256xbf16, #tpu.memory_space<vmem>>, %arg3: memref<1x256xf32, #tpu.memory_space<vmem>>, %arg4: memref<128x4xbf16, #tpu.memory_space<vmem>>, %arg5: memref<1x8x128xf32, #tpu.memory_space<vmem>>, %arg6: memref<128x1xf32, #tpu.memory_space<vmem>>) attributes {dimension_semantics = [#tpu.dimension_semantics<arbitrary>], iteration_bounds = array<i64: 1>, scalar_prefetch = 0 : i64, scratch_operands = 1 : i64, tpu.core_type = #tpu.core_type<tc>, window_params = [{transform_indices = @transform_0, window_bounds = array<i64: 128, 32>}, {pipeline_mode = #tpu.pipeline_mode<synchronous>, transform_indices = @transform_1, window_bounds = array<i64: 32, 256>}, {pipeline_mode = #tpu.pipeline_mode<synchronous>, transform_indices = @transform_2, window_bounds = array<i64: 1, 256>}, {transform_indices = @transform_3, window_bounds = array<i64: 128, 4>}, {pipeline_mode = #tpu.pipeline_mode<synchronous>, transform_indices = @transform_4, window_bounds = array<i64: 1, 8, 128>}]} {
    %c0_i32 = arith.constant 0 : i32
    %0 = arith.cmpi eq, %arg0, %c0_i32 : i32
    %1 = arith.extui %0 : i1 to i32
    %c0_i32_0 = arith.constant 0 : i32
    %2 = arith.cmpi ne, %1, %c0_i32_0 : i32
    scf.if %2 {
      %cst_30 = arith.constant 0.000000e+00 : f32
      %85 = vector.broadcast %cst_30 : f32 to vector<128x1xf32>
      %c0_31 = arith.constant 0 : index
      %c0_32 = arith.constant 0 : index
      %86 = vector.load %arg6[%c0_31, %c0_32] : memref<128x1xf32, #tpu.memory_space<vmem>>, vector<128x1xf32>
      tpu.vector_store %arg6[%c0_31, %c0_32], %85 {strides = array<i32>} : memref<128x1xf32, #tpu.memory_space<vmem>>, vector<128x1xf32>,
    } else {
    }
    %c0 = arith.constant 0 : index
    %c0_1 = arith.constant 0 : index
    %3 = vector.load %arg1[%c0, %c0_1] : memref<128x32xf32, #tpu.memory_space<vmem>>, vector<128x32xf32>
    %cst = arith.constant dense<0.000000e+00> : vector<128xf32>
    %4 = vector.multi_reduction <add>, %3, %cst [1] : vector<128x32xf32> to vector<128xf32>
    %5 = vector.shape_cast %4 : vector<128xf32> to vector<128x1xf32>
    %cst_2 = arith.constant 3.200000e+01 : f32
    %6 = vector.broadcast %cst_2 : f32 to vector<128x1xf32>
    %7 = arith.divf %5, %6 : vector<128x1xf32>
    %8 = vector.broadcast %7 : vector<128x1xf32> to vector<128x32xf32>
    %9 = arith.subf %3, %8 : vector<128x32xf32>
    %10 = arith.mulf %9, %9 : vector<128x32xf32>
    %cst_3 = arith.constant dense<0.000000e+00> : vector<128xf32>
    %11 = vector.multi_reduction <add>, %10, %cst_3 [1] : vector<128x32xf32> to vector<128xf32>
    %12 = vector.shape_cast %11 : vector<128xf32> to vector<128x1xf32>
    %cst_4 = arith.constant 3.200000e+01 : f32
    %13 = vector.broadcast %cst_4 : f32 to vector<128x1xf32>
    %14 = arith.divf %12, %13 : vector<128x1xf32>
    %cst_5 = arith.constant 9.99999974E-6 : f32
    %15 = vector.broadcast %cst_5 : f32 to vector<128x1xf32>
    %16 = arith.addf %14, %15 : vector<128x1xf32>
    %17 = math.rsqrt %16 : vector<128x1xf32>
    %18 = vector.broadcast %17 : vector<128x1xf32> to vector<128x32xf32>
    %19 = arith.mulf %9, %18 : vector<128x32xf32>
    %20 = arith.truncf %19 : vector<128x32xf32> to vector<128x32xbf16>
    %c0_6 = arith.constant 0 : index
    %c0_7 = arith.constant 0 : index
    %21 = vector.load %arg2[%c0_6, %c0_7] : memref<32x256xbf16, #tpu.memory_space<vmem>>, vector<32x256xbf16>
    %cst_8 = arith.constant dense<0.000000e+00> : vector<128x256xf32>
    %22 = tpu.matmul %20, %21, %cst_8 {dimension_numbers = #tpu.dot_dimension_numbers<[1], [0], [0], [1], [0, 0, 1, 1], [], []>} : vector<128x32xbf16>, vector<32x256xbf16>, vector<128x256xf32> -> vector<128x256xf32>
    %c0_9 = arith.constant 0 : index
    %c0_10 = arith.constant 0 : index
    %23 = vector.load %arg3[%c0_9, %c0_10] : memref<1x256xf32, #tpu.memory_space<vmem>>, vector<1x256xf32>
    %24 = vector.broadcast %23 : vector<1x256xf32> to vector<128x256xf32>
    %25 = arith.addf %22, %24 : vector<128x256xf32>
    %c0_11 = arith.constant 0 : index
    %c0_12 = arith.constant 0 : index
    %26 = vector.load %arg4[%c0_11, %c0_12] : memref<128x4xbf16, #tpu.memory_space<vmem>>, vector<128x4xbf16>
    %27 = arith.extf %26 : vector<128x4xbf16> to vector<128x4xf32>
    %28 = tpu.iota {dimensions = array<i32: 1>} : vector<128x128xi32>
    %29 = arith.sitofp %28 : vector<128x128xi32> to vector<128x128xf32>
    %30 = tpu.iota {dimensions = array<i32: 0>} : vector<128x1xi32>
    %c128_i32 = arith.constant 128 : i32
    %31 = arith.muli %arg0, %c128_i32 : i32
    %32 = vector.broadcast %31 : i32 to vector<128x1xi32>
    %33 = arith.addi %32, %30 : vector<128x1xi32>
    %c128_i32_13 = arith.constant 128 : i32
    %34 = vector.broadcast %c128_i32_13 : i32 to vector<128x1xi32>
    %35 = arith.cmpi slt, %33, %34 : vector<128x1xi32>
    %cst_14 = arith.constant 0.000000e+00 : f32
    %36 = vector.broadcast %cst_14 : f32 to vector<128x1xf32>
    %37 = vector.extract_strided_slice %25 {offsets = [0, 0], sizes = [128, 128], strides = [1, 1]} : vector<128x256xf32> to vector<128x128xf32>
    %cst_15 = arith.constant dense<0xFF800000> : vector<128xf32>
    %38 = vector.multi_reduction <maximumf>, %37, %cst_15 [1] : vector<128x128xf32> to vector<128xf32>
    %39 = vector.shape_cast %38 : vector<128xf32> to vector<128x1xf32>
    %40 = vector.broadcast %39 : vector<128x1xf32> to vector<128x128xf32>
    %41 = arith.subf %37, %40 : vector<128x128xf32>
    %42 = math.exp %41 : vector<128x128xf32>
    %cst_16 = arith.constant dense<0.000000e+00> : vector<128xf32>
    %43 = vector.multi_reduction <add>, %42, %cst_16 [1] : vector<128x128xf32> to vector<128xf32>
    %44 = vector.shape_cast %43 : vector<128xf32> to vector<128x1xf32>
    %45 = vector.extract_strided_slice %27 {offsets = [0, 0], sizes = [128, 1], strides = [1, 1]} : vector<128x4xf32> to vector<128x1xf32>
    %46 = vector.broadcast %45 : vector<128x1xf32> to vector<128x128xf32>
    %47 = arith.cmpf oeq, %29, %46 : vector<128x128xf32>
    %cst_17 = arith.constant 0.000000e+00 : f32
    %48 = vector.broadcast %cst_17 : f32 to vector<128x128xf32>
    %49 = arith.select %47, %41, %48 : vector<128x128xi1>, vector<128x128xf32>
    %cst_18 = arith.constant dense<0.000000e+00> : vector<128xf32>
    %50 = vector.multi_reduction <add>, %49, %cst_18 [1] : vector<128x128xf32> to vector<128xf32>
    %51 = vector.shape_cast %50 : vector<128xf32> to vector<128x1xf32>
    %52 = vector.extract_strided_slice %27 {offsets = [0, 2], sizes = [128, 1], strides = [1, 1]} : vector<128x4xf32> to vector<128x1xf32>
    %53 = math.log %44 : vector<128x1xf32>
    %54 = arith.subf %53, %51 : vector<128x1xf32>
    %55 = arith.mulf %52, %54 : vector<128x1xf32>
    %56 = arith.addf %36, %55 : vector<128x1xf32>
    %57 = vector.extract_strided_slice %25 {offsets = [0, 128], sizes = [128, 128], strides = [1, 1]} : vector<128x256xf32> to vector<128x128xf32>
    %cst_19 = arith.constant dense<0xFF800000> : vector<128xf32>
    %58 = vector.multi_reduction <maximumf>, %57, %cst_19 [1] : vector<128x128xf32> to vector<128xf32>
    %59 = vector.shape_cast %58 : vector<128xf32> to vector<128x1xf32>
    %60 = vector.broadcast %59 : vector<128x1xf32> to vector<128x128xf32>
    %61 = arith.subf %57, %60 : vector<128x128xf32>
    %62 = math.exp %61 : vector<128x128xf32>
    %cst_20 = arith.constant dense<0.000000e+00> : vector<128xf32>
    %63 = vector.multi_reduction <add>, %62, %cst_20 [1] : vector<128x128xf32> to vector<128xf32>
    %64 = vector.shape_cast %63 : vector<128xf32> to vector<128x1xf32>
    %65 = vector.extract_strided_slice %27 {offsets = [0, 1], sizes = [128, 1], strides = [1, 1]} : vector<128x4xf32> to vector<128x1xf32>
    %66 = vector.broadcast %65 : vector<128x1xf32> to vector<128x128xf32>
    %67 = arith.cmpf oeq, %29, %66 : vector<128x128xf32>
    %cst_21 = arith.constant 0.000000e+00 : f32
    %68 = vector.broadcast %cst_21 : f32 to vector<128x128xf32>
    %69 = arith.select %67, %61, %68 : vector<128x128xi1>, vector<128x128xf32>
    %cst_22 = arith.constant dense<0.000000e+00> : vector<128xf32>
    %70 = vector.multi_reduction <add>, %69, %cst_22 [1] : vector<128x128xf32> to vector<128xf32>
    %71 = vector.shape_cast %70 : vector<128xf32> to vector<128x1xf32>
    %72 = vector.extract_strided_slice %27 {offsets = [0, 3], sizes = [128, 1], strides = [1, 1]} : vector<128x4xf32> to vector<128x1xf32>
    %73 = math.log %64 : vector<128x1xf32>
    %74 = arith.subf %73, %71 : vector<128x1xf32>
    %75 = arith.mulf %72, %74 : vector<128x1xf32>
    %76 = arith.addf %56, %75 : vector<128x1xf32>
    %c0_23 = arith.constant 0 : index
    %c0_24 = arith.constant 0 : index
    %77 = vector.load %arg6[%c0_23, %c0_24] : memref<128x1xf32, #tpu.memory_space<vmem>>, vector<128x1xf32>
    %cst_25 = arith.constant 0.000000e+00 : f32
    %78 = vector.broadcast %cst_25 : f32 to vector<128x1xf32>
    %79 = arith.select %35, %76, %78 : vector<128x1xi1>, vector<128x1xf32>
    %80 = arith.addf %77, %79 : vector<128x1xf32>
    %c0_26 = arith.constant 0 : index
    %c0_27 = arith.constant 0 : index
    %81 = vector.load %arg6[%c0_26, %c0_27] : memref<128x1xf32, #tpu.memory_space<vmem>>, vector<128x1xf32>
    tpu.vector_store %arg6[%c0_26, %c0_27], %80 {strides = array<i32>} : memref<128x1xf32, #tpu.memory_space<vmem>>, vector<128x1xf32>,
    %c0_i32_28 = arith.constant 0 : i32
    %82 = arith.cmpi eq, %arg0, %c0_i32_28 : i32
    %83 = arith.extui %82 : i1 to i32
    %c0_i32_29 = arith.constant 0 : i32
    %84 = arith.cmpi ne, %83, %c0_i32_29 : i32
    scf.if %84 {
      %c0_30 = arith.constant 0 : index
      %c0_31 = arith.constant 0 : index
      %85 = vector.load %arg6[%c0_30, %c0_31] : memref<128x1xf32, #tpu.memory_space<vmem>>, vector<128x1xf32>
      %86 = vector.shape_cast %85 : vector<128x1xf32> to vector<1x128x1xf32>
      %cst_32 = arith.constant dense<0.000000e+00> : vector<1xf32>
      %87 = vector.multi_reduction <add>, %86, %cst_32 [1, 2] : vector<1x128x1xf32> to vector<1xf32>
      %88 = vector.shape_cast %87 : vector<1xf32> to vector<1x1x1xf32>
      %89 = vector.extract %88[0, 0, 0] : f32 from vector<1x1x1xf32>
      %90 = vector.broadcast %89 : f32 to vector<1x8x128xf32>
      %c0_33 = arith.constant 0 : index
      %c0_34 = arith.constant 0 : index
      %c0_35 = arith.constant 0 : index
      %91 = vector.load %arg5[%c0_33, %c0_34, %c0_35] : memref<1x8x128xf32, #tpu.memory_space<vmem>>, vector<1x8x128xf32>
      tpu.vector_store %arg5[%c0_33, %c0_34, %c0_35], %90 {strides = array<i32>} : memref<1x8x128xf32, #tpu.memory_space<vmem>>, vector<1x8x128xf32>,
    } else {
    }
    return
  }
  func.func @transform_0(%arg0: i32) -> (i32, i32) {
    %c0_i32 = arith.constant 0 : i32
    %c0_i32_0 = arith.constant 0 : i32
    return %arg0, %c0_i32 : i32, i32
  }
  func.func @transform_1(%arg0: i32) -> (i32, i32) {
    %c0_i32 = arith.constant 0 : i32
    %c0_i32_0 = arith.constant 0 : i32
    %c0_i32_1 = arith.constant 0 : i32
    return %c0_i32, %c0_i32_0 : i32, i32
  }
  func.func @transform_2(%arg0: i32) -> (i32, i32) {
    %c0_i32 = arith.constant 0 : i32
    %c0_i32_0 = arith.constant 0 : i32
    %c0_i32_1 = arith.constant 0 : i32
    return %c0_i32, %c0_i32_0 : i32, i32
  }
  func.func @transform_3(%arg0: i32) -> (i32, i32) {
    %c0_i32 = arith.constant 0 : i32
    %c0_i32_0 = arith.constant 0 : i32
    return %arg0, %c0_i32 : i32, i32
  }
  func.func @transform_4(%arg0: i32) -> (i32, i32, i32) {
    %c0_i32 = arith.constant 0 : i32
    %c0_i32_0 = arith.constant 0 : i32
    %c0_i32_1 = arith.constant 0 : i32
    %c0_i32_2 = arith.constant 0 : i32
    return %c0_i32, %c0_i32_0, %c0_i32_1 : i32, i32, i32
  }
}

</mosaic_0001>

<bundles_post_ra>
// kernel: tpu_custom_call.1
= control target key start
LH: loop header
LB: loop body
LE: loop exit
PB: predicated region body
PF: predicated region fallthrough
CT: control target
= control target key end

     0   :  { %vm56_vm0 = vcmask 261120   ;;  %s2783_s0 = inlined_call_operand.vmem [shape: f32[128,32], index: 0, kind: input, shape index: {}]   ;;  %s2784_s1 = inlined_call_operand.vmem [shape: bf16[32,256], index: 1, kind: input, shape index: {}]   ;;  %s2785_s2 = inlined_call_operand.vmem [shape: f32[1,256], index: 2, kind: input, shape index: {}]   ;;  %s2786_s3 = inlined_call_operand.vmem [shape: bf16[128,4], index: 3, kind: input, shape index: {}]   ;;  %s2787_s4 = inlined_call_operand.hbm [shape: f32[1,8,128], index: 4, kind: output, shape index: {}]  }
   0x1   :  { %v40_v0 = vld [vmem:[%s2783_s0] sm:$0xff]  ;;  %v42_v1 = vld [vmem:[%s2783_s0 + $0x10] sm:$0xff]  ;;  %v41_v2 = vld [vmem:[%s2783_s0 + $0x8] sm:$0xff] }
   0x2   :  { %v57_v3 = vsel %vm56_vm0, %v40_v0, 0.0  ;;  %v63_v4 = vsel %vm56_vm0, %v42_v1, 0.0  ;;  %v43_v5 = vld [vmem:[%s2783_s0 + $0x18] sm:$0xff]  ;;  %v60_v6 = vsel %vm56_vm0, %v41_v2, 0.0  ;;  %v44_v8 = vld [vmem:[%s2783_s0 + $0x20] sm:$0xff]  ;;  %v45_v9 = vld [vmem:[%s2783_s0 + $0x28] sm:$0xff] }
   0x3   :  { %58 = vadd.xlane.f32.xlu0 %v57_v3  ;;  %64 = vadd.xlane.f32.xlu1 %v63_v4  ;;  %v66_v7 = vsel %vm56_vm0, %v43_v5, 0.0 }
   0x7   :  { %61 = vadd.xlane.f32.xlu0 %v60_v6  ;;  %67 = vadd.xlane.f32.xlu1 %v66_v7 }
   0x8   :  { %9 = vsyncpa [#allocation4], 0  ;;  %v69_v10 = vsel %vm56_vm0, %v44_v8, 0.0  ;;  %v72_v11 = vsel %vm56_vm0, %v45_v9, 0.0  ;;  %v1853_v12 = vld [vmem:[%s2783_s0 + $0x40] sm:$0xff]  ;;  %v1858_v13 = vld [vmem:[%s2783_s0 + $0x48] sm:$0xff] }
   0x9   :  { %v81_v14 = vsel %vm56_vm0, %v1853_v12, 0.0  ;;  %v84_v15 = vsel %vm56_vm0, %v1858_v13, 0.0  ;;  %v1867_v16 = vld [vmem:[%s2783_s0 + $0x30] sm:$0xff]  ;;  %v1872_v17 = vld [vmem:[%s2783_s0 + $0x38] sm:$0xff]  ;;  %v1895_v24 = vld [vmem:[%s2783_s0 + $0x60] sm:$0xff]  ;;  %s1799_s18 = smov 126  }
   0xa   :  { %v75_v18 = vsel %vm56_vm0, %v1867_v16, 0.0  ;;  %v78_v19 = vsel %vm56_vm0, %v1872_v17, 0.0  ;;  %v1881_v20 = vld [vmem:[%s2783_s0 + $0x50] sm:$0xff]  ;;  %v1886_v21 = vld [vmem:[%s2783_s0 + $0x58] sm:$0xff]  ;;  %v1900_v25 = vld [vmem:[%s2783_s0 + $0x68] sm:$0xff]  ;;  %v93_v26 = vsel %vm56_vm0, %v1895_v24, 0.0 }
   0xb   :  { %70 = vadd.xlane.f32.xlu0 %v69_v10  ;;  %73 = vadd.xlane.f32.xlu1 %v72_v11  ;;  %v87_v22 = vsel %vm56_vm0, %v1881_v20, 0.0  ;;  %v90_v23 = vsel %vm56_vm0, %v1886_v21, 0.0  ;;  %v96_v27 = vsel %vm56_vm0, %v1900_v25, 0.0  ;;  %v1909_v28 = vld [vmem:[%s2783_s0 + $0x70] sm:$0xff]  ;;  %v1914_v29 = vld [vmem:[%s2783_s0 + $0x78] sm:$0xff]  ;;  %s1800_s19 = smov [#allocation3]  }
   0xc   :  { %v99_v30 = vsel %vm56_vm0, %v1909_v28, 0.0  ;;  %v102_v31 = vsel %vm56_vm0, %v1914_v29, 0.0  ;;  %s1449_s20 = sshll.u32 %s1800_s19, 4  ;;  %s1450_s20 = int_to_ptr.vmem [resolvable:$true] %s1449_s20 }
   0xd   :  { %s1771_s21 = scalar_lea.vmem %s1450_s20, 128  ;;  %p1776_p1 = scmp.lt.s32.totalorder %s1450_s20, %s1450_s20 }
   0xe   :  { %p1772_p0 = scmp.ne.s32.totalorder %s1450_s20, %s1771_s21  ;;  %p1777_p2 = scmp.lt.s32.totalorder %s1771_s21, %s1771_s21 }
   0xf   :  { %82 = vadd.xlane.f32.xlu0 %v81_v14  ;;  %85 = vadd.xlane.f32.xlu1 %v84_v15 }
  0x10   :  { %p1778_p3 = por %p1777_p2, %p1776_p1 }
  0x12   :  { %p1779_p4 = pnand %p1778_p3, %p1772_p0 }
  0x13   :  { %76 = vadd.xlane.f32.xlu0 %v75_v18  ;;  %79 = vadd.xlane.f32.xlu1 %v78_v19 }
  0x17   :  { %88 = vadd.xlane.f32.xlu0 %v87_v22  ;;  %91 = vadd.xlane.f32.xlu1 %v90_v23 }
  0x1b   :  { %94 = vadd.xlane.f32.xlu0 %v93_v26  ;;  %97 = vadd.xlane.f32.xlu1 %v96_v27 }
  0x1f   :  { %100 = vadd.xlane.f32.xlu0 %v99_v30  ;;  %103 = vadd.xlane.f32.xlu1 %v102_v31 }
  0x90   :  { %v59_v32 = vpop.xlane.xlu0 %58  ;;  %v65_v33 = vpop.xlane.xlu1 %64 }
  0x91   :  { %v106_v34 = vmul.f32 0.03125, %v59_v32  ;;  %v108_v35 = vmul.f32 0.03125, %v65_v33 }
  0x93   :  { %v1920_v36 = vsub.f32 %v40_v0, %v106_v34  ;;  %v1922_v37 = vsub.f32 %v42_v1, %v108_v35 }
  0x94   :  { %v62_v38 = vpop.xlane.xlu0 %61  ;;  %v68_v39 = vpop.xlane.xlu1 %67 }
  0x95   :  { %v107_v40 = vmul.f32 0.03125, %v62_v38  ;;  %v109_v41 = vmul.f32 0.03125, %v68_v39  ;;  %v138_v42 = vmul.f32 %v1920_v36, %v1920_v36  ;;  %v140_v43 = vmul.f32 %v1922_v37, %v1922_v37 }
  0x97   :  { %v1928_v44 = vsub.f32 %v41_v2, %v107_v40  ;;  %v1930_v45 = vsub.f32 %v43_v5, %v109_v41  ;;  %v154_v46 = vsel %vm56_vm0, %v138_v42, 0.0  ;;  %v160_v49 = vsel %vm56_vm0, %v140_v43, 0.0 }
  0x98   :  { %155 = vadd.xlane.f32.xlu0 %v154_v46  ;;  %v71_v47 = vpop.xlane.xlu0 %70  ;;  %v74_v48 = vpop.xlane.xlu1 %73 }
  0x99   :  { %v110_v50 = vmul.f32 0.03125, %v71_v47  ;;  %v111_v51 = vmul.f32 0.03125, %v74_v48  ;;  %v139_v52 = vmul.f32 %v1928_v44, %v1928_v44  ;;  %v141_v53 = vmul.f32 %v1930_v45, %v1930_v45 }
  0x9b   :  { %v1938_v54 = vsub.f32 %v44_v8, %v110_v50  ;;  %v1940_v55 = vsub.f32 %v45_v9, %v111_v51  ;;  %v157_v56 = vsel %vm56_vm0, %v139_v52, 0.0  ;;  %v163_v59 = vsel %vm56_vm0, %v141_v53, 0.0  ;;  %v1607_v53 = vld [vmem:[%s2784_s1] ss:$8 sps:$4 sm:$0xff]  }
  0x9c   :  { %161 = vadd.xlane.f32.xlu0 %v160_v49  ;;  %158 = vadd.xlane.f32.xlu1 %v157_v56  ;;  %v83_v57 = vpop.xlane.xlu0 %82  ;;  %v86_v58 = vpop.xlane.xlu1 %85  ;;  %v1608_v56 = vld [vmem:[%s2784_s1 + $0x14] ss:$8 sps:$4 sm:$0xff]  }
  0x9d   :  { %v114_v60 = vmul.f32 0.03125, %v83_v57  ;;  %v115_v61 = vmul.f32 0.03125, %v86_v58  ;;  %v142_v62 = vmul.f32 %v1938_v54, %v1938_v54  ;;  %v143_v63 = vmul.f32 %v1940_v55, %v1940_v55  ;;  %v1610_v57 = vld [vmem:[%s2784_s1 + $0x10] ss:$8 sps:$4 sm:$0xff]  }
  0x9e   :  { %v1795_v58 = vmov 0  }
  0x9f   :  { %v1949_v0 = vsub.f32 %v1853_v12, %v114_v60  ;;  %v1952_v1 = vsub.f32 %v1858_v13, %v115_v61  ;;  %v166_v2 = vsel %vm56_vm0, %v142_v62, 0.0  ;;  %v169_v5 = vsel %vm56_vm0, %v143_v63, 0.0  ;;  %366 = vmatprep.mubr.bf16.mxu0 %v1795_v58  ;;  %406 = vmatprep.mubr.bf16.mxu1 %v1795_v58  ;;  %v1502_v60 = vld [vmem:[%s2786_s3 + $0x10] sm:$0xff]  }
  0xa0   :  { %164 = vadd.xlane.f32.xlu1 %v163_v59  ;;  %167 = vadd.xlane.f32.xlu0 %v166_v2  ;;  %v77_v3 = vpop.xlane.xlu0 %76  ;;  %v80_v4 = vpop.xlane.xlu1 %79  ;;  %v1501_v59 = vld [vmem:[%s2786_s3 + $0x8] sm:$0xff]   ;;  %v1796_v61 = vmov 1   ;;  %v2035_v2 = vunpack.c.l.bf16 %v1502_v60 }
  0xa1   :  { %v112_v6 = vmul.f32 0.03125, %v77_v3  ;;  %v113_v7 = vmul.f32 0.03125, %v80_v4  ;;  %v146_v8 = vmul.f32 %v1949_v0, %v1949_v0  ;;  %v147_v9 = vmul.f32 %v1952_v1, %v1952_v1  ;;  %1526 = vset.pattern.permute.xlu1 %v1796_v61  ;;  %1520 = vset.pattern.permute.xlu0 %v1796_v61  ;;  %v1503_v4 = vld [vmem:[%s2786_s3 + $0x18] sm:$0xff]  }
  0xa2   :  { %v2031_v62 = vunpack.c.l.bf16 %v1501_v59  ;;  %v2033_v63 = vunpack.c.h.bf16 %v1501_v59  ;;  %2817 = vst [vmem:[#allocation7_spill] sm:$0xff] %v2035_v2  ;;  %v2037_v3 = vunpack.c.h.bf16 %v1502_v60 }
  0xa3   :  { %v1961_v10 = vsub.f32 %v1867_v16, %v112_v6  ;;  %v1964_v11 = vsub.f32 %v1872_v17, %v113_v7  ;;  %v178_v12 = vsel %vm56_vm0, %v146_v8, 0.0  ;;  %v181_v15 = vsel %vm56_vm0, %v147_v9, 0.0  ;;  %v1470_v6 = vld [vmem:[%s2786_s3] sm:$0xff]  }
  0xa4   :  { %170 = vadd.xlane.f32.xlu1 %v169_v5  ;;  %179 = vadd.xlane.f32.xlu0 %v178_v12  ;;  %v89_v13 = vpop.xlane.xlu0 %88  ;;  %v92_v14 = vpop.xlane.xlu1 %91  ;;  %2816 = vst [vmem:[#allocation6_spill] sm:$0xff] %v2033_v63  ;;  %2818 = vst [vmem:[#allocation8_spill] sm:$0xff] %v2037_v3  ;;  %v1527_v5 = vpack.i.bf16 %v2033_v63, %v2031_v62  ;;  %v1532_v7 = vpack.i.bf16 %v2037_v3, %v2035_v2  ;;  %v2050_v8 = vunpack.c.l.bf16 %v1503_v4  ;;  %v1504_v12 = vld [vmem:[%s2786_s3 + $0x20] sm:$0xff]  }
  0xa5   :  { %v116_v18 = vmul.f32 0.03125, %v89_v13  ;;  %v117_v19 = vmul.f32 0.03125, %v92_v14  ;;  %v144_v22 = vmul.f32 %v1961_v10, %v1961_v10  ;;  %v145_v16 = vmul.f32 %v1964_v11, %v1964_v11 }
  0xa6   :  { %2819 = vst [vmem:[#allocation9_spill] sm:$0xff] %v2050_v8  ;;  %v2052_v9 = vunpack.c.h.bf16 %v1503_v4  ;;  %v2057_v13 = vunpack.c.l.bf16 %v1470_v6  ;;  %v2059_v14 = vunpack.c.h.bf16 %v1470_v6 }
  0xa7   :  { %v1973_v23 = vsub.f32 %v1881_v20, %v116_v18  ;;  %v1976_v17 = vsub.f32 %v1886_v21, %v117_v19  ;;  %v172_v26 = vsel %vm56_vm0, %v144_v22, 0.0  ;;  %v175_v31 = vsel %vm56_vm0, %v145_v16, 0.0  ;;  %v1505_v16 = vld [vmem:[%s2786_s3 + $0x28] sm:$0xff]  }
  0xa8   :  { %182 = vadd.xlane.f32.xlu1 %v181_v15  ;;  %173 = vadd.xlane.f32.xlu0 %v172_v26  ;;  %v95_v27 = vpop.xlane.xlu0 %94  ;;  %v98_v30 = vpop.xlane.xlu1 %97  ;;  %2820 = vst [vmem:[#allocation10_spill] sm:$0xff] %v2052_v9  ;;  %2821 = vst [vmem:[#allocation11_spill] sm:$0xff] %v2059_v14  ;;  %v1521_v15 = vpack.i.bf16 %v2059_v14, %v2057_v13  ;;  %v1537_v18 = vpack.i.bf16 %v2052_v9, %v2050_v8  ;;  %v2065_v19 = vunpack.c.l.bf16 %v1504_v12 }
  0xa9   :  { %v118_v32 = vmul.f32 0.03125, %v95_v27  ;;  %v119_v33 = vmul.f32 0.03125, %v98_v30  ;;  %v148_v34 = vmul.f32 %v1973_v23, %v1973_v23  ;;  %v149_v20 = vmul.f32 %v1976_v17, %v1976_v17 }
  0xaa   :  { %2822 = vst [vmem:[#allocation12_spill] sm:$0xff] %v2065_v19  ;;  %v2067_v22 = vunpack.c.h.bf16 %v1504_v12  ;;  %v2074_v27 = vunpack.c.l.bf16 %v1505_v16  ;;  %v2076_v30 = vunpack.c.h.bf16 %v1505_v16 }
  0xab   :  { %v1985_v35 = vsub.f32 %v1895_v24, %v118_v32  ;;  %v1988_v21 = vsub.f32 %v1900_v25, %v119_v33  ;;  %v184_v38 = vsel %vm56_vm0, %v148_v34, 0.0  ;;  %v187_v41 = vsel %vm56_vm0, %v149_v20, 0.0  ;;  %v1507_v20 = vld [vmem:[%s2786_s3 + $0x38] sm:$0xff]  }
  0xac   :  { %176 = vadd.xlane.f32.xlu1 %v175_v31  ;;  %185 = vadd.xlane.f32.xlu0 %v184_v38  ;;  %v101_v39 = vpop.xlane.xlu0 %100  ;;  %v104_v40 = vpop.xlane.xlu1 %103  ;;  %2823 = vst [vmem:[#allocation13_spill] sm:$0xff] %v2067_v22  ;;  %v1542_v26 = vpack.i.bf16 %v2067_v22, %v2065_v19  ;;  %2824 = vst [vmem:[#allocation14_spill] sm:$0xff] %v2074_v27  ;;  %v1506_v31 = vld [vmem:[%s2786_s3 + $0x30] sm:$0xff]   ;;  %v1547_v32 = vpack.i.bf16 %v2076_v30, %v2074_v27 }
  0xad   :  { %v120_v42 = vmul.f32 0.03125, %v101_v39  ;;  %v121_v43 = vmul.f32 0.03125, %v104_v40  ;;  %v150_v46 = vmul.f32 %v1985_v35, %v1985_v35  ;;  %v151_v24 = vmul.f32 %v1988_v21, %v1988_v21  ;;  %2825 = vst [vmem:[#allocation15_spill] sm:$0xff] %v2076_v30 }
  0xae   :  { %v2084_v33 = vunpack.c.l.bf16 %v1506_v31  ;;  %v2086_v34 = vunpack.c.h.bf16 %v1506_v31  ;;  %v2093_v39 = vunpack.c.l.bf16 %v1507_v20  ;;  %v2095_v40 = vunpack.c.h.bf16 %v1507_v20 }
  0xaf   :  { %v1997_v47 = vsub.f32 %v1909_v28, %v120_v42  ;;  %v2000_v25 = vsub.f32 %v1914_v29, %v121_v43  ;;  %v190_v48 = vsel %vm56_vm0, %v150_v46, 0.0  ;;  %v193_v49 = vsel %vm56_vm0, %v151_v24, 0.0  ;;  %v1605_v28 = vld [vmem:[%s2784_s1 + $0x4] ss:$8 sps:$4 sm:$0xff]  }
  0xb0   :  { %188 = vadd.xlane.f32.xlu1 %v187_v41  ;;  %191 = vadd.xlane.f32.xlu0 %v190_v48  ;;  %2826 = vst [vmem:[#allocation16_spill] sm:$0xff] %v2084_v33  ;;  %2827 = vst [vmem:[#allocation17_spill] sm:$0xff] %v2086_v34  ;;  %v1552_v38 = vpack.i.bf16 %v2086_v34, %v2084_v33  ;;  %v2099_v41 = vpack.i.bf16 %v2095_v40, %v2093_v39 }
  0xb1   :  { %v152_v50 = vmul.f32 %v1997_v47, %v1997_v47  ;;  %v153_v51 = vmul.f32 %v2000_v25, %v2000_v25  ;;  %334 = vmatprep.subr.bf16.mxu0 %v1605_v28  ;;  %1508 = vmatprep.subr.bf16.mxu1 %v1605_v28  ;;  %2828 = vst [vmem:[#allocation18_spill] sm:$0xff] %v2093_v39  ;;  %2829 = vst [vmem:[#allocation19_spill] sm:$0xff] %v2095_v40 }
  0xb2   :  { %335 = vmatpush1.bf16.msra.mxu0 %v1607_v53  ;;  %1510 = vmatpush1.bf16.msra.mxu1 %v1607_v53 }
  0xb3   :  { %v196_v52 = vsel %vm56_vm0, %v152_v50, 0.0  ;;  %v199_v29 = vsel %vm56_vm0, %v153_v51, 0.0  ;;  %336 = vmatprep.subr.bf16.mxu0 %v1608_v56  ;;  %1509 = vmatprep.subr.bf16.mxu1 %v1608_v56 }
  0xb4   :  { %194 = vadd.xlane.f32.xlu1 %v193_v49  ;;  %197 = vadd.xlane.f32.xlu0 %v196_v52 }
  0xb6   :  { %337 = vmatpush1.bf16.msra.mxu0 %v1610_v57  ;;  %1511 = vmatpush1.bf16.msra.mxu1 %v1610_v57 }
  0xb8   :  { %200 = vadd.xlane.f32.xlu1 %v199_v29 }
  0xc9   :  { %1528 = vperm.xlu1 %1526, %v1527_v5  }
  0xca   :  { %1522 = vperm.xlu0 %1520, %v1521_v15  }
  0xcd   :  { %1533 = vperm.xlu1 %1526, %v1532_v7  }
  0xce   :  { %1568 = vset.pattern.permute.xlu0 %v1795_v58 }
  0xcf   :  { %1570 = vperm.xlu0 %1568, %v1527_v5  }
  0xd1   :  { %1538 = vperm.xlu1 %1526, %v1537_v18  }
  0xd3   :  { %1580 = vperm.xlu0 %1568, %v1537_v18  }
  0xd5   :  { %1543 = vperm.xlu1 %1526, %v1542_v26  }
  0xd7   :  { %1590 = vperm.xlu0 %1568, %v1547_v32  }
  0xd9   :  { %1548 = vperm.xlu1 %1526, %v1547_v32  }
  0xdd   :  { %1553 = vperm.xlu1 %1526, %v1552_v38  }
  0xe1   :  { %1558 = vperm.xlu1 %1526, %v2099_v41  }
  0xe5   :  { %1562 = vset.pattern.permute.xlu1 %v1795_v58 }
  0xe6   :  { %1564 = vperm.xlu1 %1562, %v1521_v15  }
  0xea   :  { %1575 = vperm.xlu1 %1562, %v1532_v7  }
  0xee   :  { %1585 = vperm.xlu1 %1562, %v1542_v26  }
  0xf2   :  { %1595 = vperm.xlu1 %1562, %v1552_v38  }
 0x125   :  { %v156_v42 = vpop.xlane.xlu0 %155 }
 0x126   :  { %v202_v43 = vmul.f32 0.03125, %v156_v42 }
 0x128   :  { %v218_v46 = vadd.f32 1e-05, %v202_v43 }
 0x129   :  { %v159_v24 = vpop.xlane.xlu1 %158  ;;  %v162_v48 = vpop.xlane.xlu0 %161 }
 0x12a   :  { %v203_v49 = vmul.f32 0.03125, %v159_v24  ;;  %1611 = vrsqrt.f32 %v218_v46  ;;  %v204_v51 = vmul.f32 0.03125, %v162_v48 }
 0x12c   :  { %v219_v50 = vadd.f32 1e-05, %v203_v49  ;;  %v220_v53 = vadd.f32 1e-05, %v204_v51 }
 0x12d   :  { %v165_v52 = vpop.xlane.xlu1 %164  ;;  %v168_v28 = vpop.xlane.xlu0 %167 }
 0x12e   :  { %1613 = vrsqrt.f32 %v219_v50  ;;  %v205_v29 = vmul.f32 0.03125, %v165_v52  ;;  %v206_v5 = vmul.f32 0.03125, %v168_v28 }
 0x130   :  { %v221_v56 = vadd.f32 1e-05, %v205_v29  ;;  %v222_v31 = vadd.f32 1e-05, %v206_v5 }
 0x131   :  { %v171_v57 = vpop.xlane.xlu1 %170  ;;  %v180_v59 = vpop.xlane.xlu0 %179 }
 0x132   :  { %1615 = vrsqrt.f32 %v221_v56  ;;  %v207_v60 = vmul.f32 0.03125, %v171_v57  ;;  %v210_v4 = vmul.f32 0.03125, %v180_v59 }
 0x133   :  { %1617 = vrsqrt.f32 %v220_v53 }
 0x134   :  { %v226_v6 = vadd.f32 1e-05, %v210_v4  ;;  %v223_v7 = vadd.f32 1e-05, %v207_v60  ;;  %v1612_v18 = vpop.eup %1611 }
 0x135   :  { %v183_v12 = vpop.xlane.xlu1 %182  ;;  %v174_v15 = vpop.xlane.xlu0 %173  ;;  %v250_v42 = vmul.f32 %v1612_v18, %v1920_v36 }
 0x136   :  { %v211_v16 = vmul.f32 0.03125, %v183_v12  ;;  %1619 = vrsqrt.f32 %v226_v6  ;;  %v208_v50 = vmul.f32 0.03125, %v174_v15 }
 0x137   :  { %1621 = vrsqrt.f32 %v223_v7 }
 0x138   :  { %v1614_v26 = vpop.eup %1613  ;;  %v227_v32 = vadd.f32 1e-05, %v211_v16 }
 0x139   :  { %v177_v20 = vpop.xlane.xlu1 %176  ;;  %v186_v38 = vpop.xlane.xlu0 %185  ;;  %v251_v43 = vmul.f32 %v1614_v26, %v1928_v44  ;;  %v224_v44 = vadd.f32 1e-05, %v208_v50 }
 0x13a   :  { %1623 = vrsqrt.f32 %v227_v32  ;;  %v209_v46 = vmul.f32 0.03125, %v177_v20  ;;  %v212_v24 = vmul.f32 0.03125, %v186_v38 }
 0x13b   :  { %v266_v48 = vpack.c.bf16 %v251_v43, %v250_v42  ;;  %1625 = vrsqrt.f32 %v222_v31 }
 0x13c   :  { %v1616_v49 = vpop.eup %1615  ;;  %v228_v51 = vadd.f32 1e-05, %v212_v24  ;;  %v225_v52 = vadd.f32 1e-05, %v209_v46 }
 0x13d   :  { %v189_v28 = vpop.xlane.xlu1 %188  ;;  %1461 = vmatmul.mubr.msk.bf16.vlgmr.msra.gmra.mrb[0].mxu0 %vm56_vm0, %v266_v48  ;;  %v192_v29 = vpop.xlane.xlu0 %191  ;;  %v253_v36 = vmul.f32 %v1616_v49, %v1930_v45 }
 0x13e   :  { %v1618_v53 = vpop.eup %1617  ;;  %v213_v56 = vmul.f32 0.03125, %v189_v28  ;;  %376 = vmatprep.mubr.bf16.mxu0 %v1795_v58  ;;  %1627 = vrsqrt.f32 %v228_v51  ;;  %v214_v59 = vmul.f32 0.03125, %v192_v29 }
 0x13f   :  { %1629 = vrsqrt.f32 %v225_v52  ;;  %v252_v4 = vmul.f32 %v1618_v53, %v1922_v37 }
 0x140   :  { %v229_v57 = vadd.f32 1e-05, %v213_v56  ;;  %v1620_v5 = vpop.eup %1619  ;;  %v230_v18 = vadd.f32 1e-05, %v214_v59 }
 0x141   :  { %v195_v60 = vpop.xlane.xlu1 %194  ;;  %v1622_v7 = vpop.eup %1621  ;;  %v267_v12 = vpack.c.bf16 %v253_v36, %v252_v4  ;;  %v258_v45 = vmul.f32 %v1620_v5, %v1949_v0  ;;  %v280_v4 = vlaneseq }
 0x142   :  { %1631 = vrsqrt.f32 %v229_v57  ;;  %v215_v6 = vmul.f32 0.03125, %v195_v60  ;;  %v198_v26 = vpop.xlane.xlu0 %197  ;;  %v255_v42 = vmul.f32 %v1622_v7, %v1940_v55 }
 0x143   :  { %1633 = vrsqrt.f32 %v224_v44  ;;  %v216_v43 = vmul.f32 0.03125, %v198_v26 }
 0x144   :  { %v1624_v15 = vpop.eup %1623  ;;  %v231_v16 = vadd.f32 1e-05, %v215_v6 }
 0x145   :  { %v201_v31 = vpop.xlane.xlu1 %200  ;;  %1462 = vmatmul.mubr.msk.bf16.gmra.mrb[4].mxu0 %vm56_vm0, %v267_v12  ;;  %v259_v32 = vmul.f32 %v1624_v15, %v1952_v1  ;;  %v1626_v20 = vpop.eup %1625  ;;  %v232_v50 = vadd.f32 1e-05, %v216_v43 }
 0x146   :  { %1635 = vrsqrt.f32 %v231_v16  ;;  %v217_v37 = vmul.f32 0.03125, %v201_v31  ;;  %386 = vmatprep.mubr.bf16.mxu0 %v1795_v58  ;;  %v254_v46 = vmul.f32 %v1626_v20, %v1938_v54 }
 0x147   :  { %v270_v38 = vpack.c.bf16 %v259_v32, %v258_v45  ;;  %1637 = vrsqrt.f32 %v230_v18 }
 0x148   :  { %v1628_v24 = vpop.eup %1627  ;;  %v233_v48 = vadd.f32 1e-05, %v217_v37  ;;  %v268_v1 = vpack.c.bf16 %v255_v42, %v254_v46 }
 0x149   :  { %1465 = vmatmul.mubr.msk.bf16.vlgmr.msra.gmra.mrb[0].mxu1 %vm56_vm0, %v270_v38  ;;  %v1630_v0 = vpop.eup %1629  ;;  %v260_v51 = vmul.f32 %v1628_v24, %v1973_v23 }
 0x14a   :  { %416 = vmatprep.mubr.bf16.mxu1 %v1795_v58  ;;  %1639 = vrsqrt.f32 %v233_v48  ;;  %v257_v54 = vmul.f32 %v1630_v0, %v1964_v11 }
 0x14b   :  { %1641 = vrsqrt.f32 %v232_v50 }
 0x14c   :  { %v1632_v49 = vpop.eup %1631 }
 0x14d   :  { %1463 = vmatmul.mubr.msk.bf16.gmra.mrb[8].mxu0 %vm56_vm0, %v268_v1  ;;  %v261_v55 = vmul.f32 %v1632_v49, %v1976_v17  ;;  %v1634_v52 = vpop.eup %1633 }
 0x14e   :  { %396 = vmatprep.mubr.bf16.mxu0 %v1795_v58  ;;  %v256_v53 = vmul.f32 %v1634_v52, %v1961_v10 }
 0x14f   :  { %v271_v28 = vpack.c.bf16 %v261_v55, %v260_v51 }
 0x150   :  { %v1636_v29 = vpop.eup %1635  ;;  %v269_v36 = vpack.c.bf16 %v257_v54, %v256_v53 }
 0x151   :  { %1466 = vmatmul.mubr.msk.bf16.gmra.mrb[4].mxu1 %vm56_vm0, %v271_v28  ;;  %v1638_v56 = vpop.eup %1637  ;;  %v263_v23 = vmul.f32 %v1636_v29, %v1988_v21  ;;  %v281_v21 = vshrl.u32 %v280_v4, 7 }
 0x152   :  { %426 = vmatprep.mubr.bf16.mxu1 %v1795_v58  ;;  %v262_v17 = vmul.f32 %v1638_v56, %v1985_v35  ;;  %v278_v35 = vld [vmem:[%s2785_s2] sm:$0x3]  ;;  %s1797_s2 = smov 127  }
 0x153   :  { %v282_v5 = vsub.s32 0, %v281_v21  ;;  %v286_v6 = vsub.s32 1, %v281_v21 }
 0x154   :  { %v272_v44 = vpack.c.bf16 %v263_v23, %v262_v17  ;;  %v1640_v57 = vpop.eup %1639 }
 0x155   :  { %1464 = vmatmul.mubr.msk.bf16.gmra.mrb[12].mxu0 %vm56_vm0, %v269_v36  ;;  %v1642_v11 = vpop.eup %1641  ;;  %v265_v59 = vmul.f32 %v1640_v57, %v2000_v25  ;;  %v2137_v7 = vrot.slane %v278_v35, %v282_v5  ;;  %v2139_v12 = vrot.slane %v278_v35, %v286_v6 }
 0x156   :  { %v264_v10 = vmul.f32 %v1642_v11, %v1997_v47 }
 0x158   :  { %v273_v60 = vpack.c.bf16 %v265_v59, %v264_v10 }
 0x159   :  { %1467 = vmatmul.mubr.msk.bf16.gmra.mrb[8].mxu1 %vm56_vm0, %v272_v44 }
 0x15a   :  { %436 = vmatprep.mubr.bf16.mxu1 %v1795_v58 }
 0x161   :  { %1468 = vmatmul.mubr.msk.bf16.gmra.mrb[12].mxu1 %vm56_vm0, %v273_v60 }
 0x210   :  { %v368_v58 = vpop.f32.mrb[0].mxu0 }
 0x211   :  { %v2142_v25 = vadd.f32 %v368_v58, %v2137_v7  ;;  %v370_v47 = vpop.f32.mrb[1].mxu0 }
 0x212   :  { %v2145_v15 = vadd.f32 %v370_v47, %v2139_v12  ;;  %v372_v18 = vpop.f32.mrb[2].mxu0 }
 0x213   :  { %v374_v16 = vpop.f32.mrb[3].mxu0  ;;  %533 = vmax.xlane.f32.xlu0 %v2142_v25  ;;  %v2161_v1 = vadd.f32 %v372_v18, %v2137_v7 }
 0x214   :  { %869 = vmax.xlane.f32.xlu1 %v2145_v15  ;;  %v2158_v48 = vadd.f32 %v374_v16, %v2139_v12 }
 0x218   :  { %v378_v26 = vpop.f32.mrb[4].mxu0 }
 0x219   :  { %v380_v31 = vpop.f32.mrb[5].mxu0  ;;  %v2177_v23 = vadd.f32 %v378_v26, %v2137_v7 }
 0x21a   :  { %v382_v45 = vpop.f32.mrb[6].mxu0  ;;  %v2191_v21 = vadd.f32 %v380_v31, %v2139_v12 }
 0x21b   :  { %v384_v32 = vpop.f32.mrb[7].mxu0  ;;  %v2188_v10 = vadd.f32 %v382_v45, %v2137_v7 }
 0x21c   :  { %v408_v20 = vpop.f32.mrb[0].mxu1  ;;  %v2196_v6 = vadd.f32 %v384_v32, %v2139_v12 }
 0x21d   :  { %v2150_v37 = vadd.f32 %v408_v20, %v2137_v7  ;;  %v410_v38 = vpop.f32.mrb[1].mxu1 }
 0x21e   :  { %v2153_v42 = vadd.f32 %v410_v38, %v2139_v12  ;;  %v412_v43 = vpop.f32.mrb[2].mxu1 }
 0x21f   :  { %v414_v46 = vpop.f32.mrb[3].mxu1  ;;  %549 = vmax.xlane.f32.xlu0 %v2150_v37  ;;  %v2169_v28 = vadd.f32 %v412_v43, %v2137_v7 }
 0x220   :  { %v388_v24 = vpop.f32.mrb[8].mxu0  ;;  %885 = vmax.xlane.f32.xlu1 %v2153_v42  ;;  %v2166_v55 = vadd.f32 %v414_v46, %v2139_v12 }
 0x221   :  { %v390_v0 = vpop.f32.mrb[9].mxu0  ;;  %v2218_v38 = vadd.f32 %v388_v24, %v2137_v7 }
 0x222   :  { %v392_v49 = vpop.f32.mrb[10].mxu0  ;;  %v2221_v43 = vadd.f32 %v390_v0, %v2139_v12 }
 0x223   :  { %v394_v50 = vpop.f32.mrb[11].mxu0  ;;  %871 = vmax.xlane.f32.xlu0 %v2158_v48  ;;  %v2237_v0 = vadd.f32 %v392_v49, %v2137_v7 }
 0x224   :  { %535 = vmax.xlane.f32.xlu1 %v2161_v1  ;;  %v418_v51 = vpop.f32.mrb[4].mxu1  ;;  %v2234_v24 = vadd.f32 %v394_v50, %v2139_v12 }
 0x225   :  { %v420_v52 = vpop.f32.mrb[5].mxu1  ;;  %v2174_v56 = vadd.f32 %v418_v51, %v2137_v7 }
 0x226   :  { %v422_v54 = vpop.f32.mrb[6].mxu1  ;;  %v2199_v58 = vadd.f32 %v420_v52, %v2139_v12 }
 0x227   :  { %887 = vmax.xlane.f32.xlu0 %v2166_v55  ;;  %v424_v29 = vpop.f32.mrb[7].mxu1  ;;  %v2207_v26 = vadd.f32 %v422_v54, %v2137_v7 }
 0x228   :  { %551 = vmax.xlane.f32.xlu1 %v2169_v28  ;;  %v398_v53 = vpop.f32.mrb[12].mxu0  ;;  %v2204_v18 = vadd.f32 %v424_v29, %v2139_v12 }
 0x229   :  { %v400_v36 = vpop.f32.mrb[13].mxu0  ;;  %v2250_v50 = vadd.f32 %v398_v53, %v2137_v7  ;;  %v2268_v53 = vpop.permute.xlu1 %1528 }
 0x22a   :  { %v402_v17 = vpop.f32.mrb[14].mxu0  ;;  %v2253_v49 = vadd.f32 %v400_v36, %v2139_v12 }
 0x22b   :  { %v2180_v44 = vadd.f32 %v402_v17, %v2137_v7  ;;  %v404_v57 = vpop.f32.mrb[15].mxu0  ;;  %553 = vmax.xlane.f32.xlu0 %v2174_v56 }
 0x22c   :  { %v2184_v11 = vadd.f32 %v404_v57, %v2139_v12  ;;  %537 = vmax.xlane.f32.xlu1 %v2177_v23  ;;  %v428_v59 = vpop.f32.mrb[8].mxu1 }
 0x22d   :  { %v430_v60 = vpop.f32.mrb[9].mxu1  ;;  %v2226_v46 = vadd.f32 %v428_v59, %v2137_v7  ;;  %v2270_v36 = vpop.permute.xlu1 %1533 }
 0x22e   :  { %v432_v5 = vpop.f32.mrb[10].mxu1  ;;  %v2229_v51 = vadd.f32 %v430_v60, %v2139_v12 }
 0x22f   :  { %539 = vmax.xlane.f32.xlu0 %v2188_v10  ;;  %v434_v35 = vpop.f32.mrb[11].mxu1  ;;  %v2245_v54 = vadd.f32 %v432_v5, %v2137_v7  ;;  %v1523_v5 = vpop.permute.xlu0 %1522 }
 0x230   :  { %873 = vmax.xlane.f32.xlu1 %v2191_v21  ;;  %v2242_v52 = vadd.f32 %v434_v35, %v2139_v12  ;;  %v1524_v30 = vunpack.i.l.bf16 %v1523_v5 }
 0x233   :  { %875 = vmax.xlane.f32.xlu0 %v2196_v6 }
 0x234   :  { %889 = vmax.xlane.f32.xlu1 %v2199_v58  ;;  %v438_v47 = vpop.f32.mrb[12].mxu1 }
 0x235   :  { %v440_v16 = vpop.f32.mrb[13].mxu1  ;;  %v2258_v29 = vadd.f32 %v438_v47, %v2137_v7  ;;  %v2283_v47 = vpop.permute.xlu0 %1570 }
 0x236   :  { %v442_v31 = vpop.f32.mrb[14].mxu1  ;;  %v2261_v17 = vadd.f32 %v440_v16, %v2139_v12 }
 0x237   :  { %v2210_v45 = vadd.f32 %v442_v31, %v2137_v7  ;;  %891 = vmax.xlane.f32.xlu0 %v2204_v18  ;;  %v444_v32 = vpop.f32.mrb[15].mxu1  ;;  %v2274_v7 = vpop.permute.xlu1 %1538  ;;  %v480_v31 = vand.u32 127, %v280_v4 }
 0x238   :  { %v2214_v20 = vadd.f32 %v444_v32, %v2139_v12  ;;  %555 = vmax.xlane.f32.xlu1 %v2207_v26 }
 0x239   :  { %v2296_v27 = vcvt.s32.f32 %v480_v31 }
 0x23b   :  { %541 = vmax.xlane.f32.xlu0 %v2218_v38  ;;  %v1544_v12 = vpop.permute.xlu1 %1543  ;;  %vm1045_vm2 = vcmp.eq.f32.partialorder %v2296_v27, %v1524_v30  ;;  %v1525_v30 = vunpack.i.h.bf16 %v1523_v5  ;;  %v1572_v5 = vunpack.i.l.bf16 %v2283_v47 }
 0x23c   :  { %877 = vmax.xlane.f32.xlu1 %v2221_v43  ;;  %v1545_v9 = vunpack.i.l.bf16 %v1544_v12 }
 0x23d   :  { %vm1046_vm5 = vcmp.eq.f32.partialorder %v2296_v27, %v1525_v30  ;;  %vm727_vm8 = vcmp.eq.f32.partialorder %v2296_v27, %v1572_v5 }
 0x23e   :  { %vm1053_vm3 = vcmp.eq.f32.partialorder %v2296_v27, %v1545_v9 }
 0x23f   :  { %557 = vmax.xlane.f32.xlu0 %v2226_v46  ;;  %v2276_v57 = vpop.permute.xlu1 %1548 }
 0x240   :  { %893 = vmax.xlane.f32.xlu1 %v2229_v51 }
 0x243   :  { %879 = vmax.xlane.f32.xlu0 %v2234_v24  ;;  %v2278_v59 = vpop.permute.xlu1 %1553 }
 0x244   :  { %543 = vmax.xlane.f32.xlu1 %v2237_v0 }
 0x247   :  { %895 = vmax.xlane.f32.xlu0 %v2242_v52  ;;  %v2280_v60 = vpop.permute.xlu1 %1558 }
 0x248   :  { %559 = vmax.xlane.f32.xlu1 %v2245_v54 }
 0x24b   :  { %545 = vmax.xlane.f32.xlu0 %v2250_v50  ;;  %v1565_v35 = vpop.permute.xlu1 %1564 }
 0x24c   :  { %881 = vmax.xlane.f32.xlu1 %v2253_v49  ;;  %v1566_v33 = vunpack.i.l.bf16 %v1565_v35  ;;  %v1567_v63 = vunpack.i.h.bf16 %v1565_v35 }
 0x24e   :  { %vm725_vm1 = vcmp.eq.f32.partialorder %v2296_v27, %v1566_v33  ;;  %vm726_vm4 = vcmp.eq.f32.partialorder %v2296_v27, %v1567_v63 }
 0x24f   :  { %561 = vmax.xlane.f32.xlu0 %v2258_v29  ;;  %v2285_v16 = vpop.permute.xlu1 %1575 }
 0x250   :  { %897 = vmax.xlane.f32.xlu1 %v2261_v17 }
 0x253   :  { %883 = vmax.xlane.f32.xlu0 %v2184_v11 }
 0x254   :  { %547 = vmax.xlane.f32.xlu1 %v2180_v44 }
 0x258   :  { %563 = vmax.xlane.f32.xlu1 %v2210_v45 }
 0x269   :  { %1600 = vperm.xlu0 %1568, %v2099_v41   ;;  %v2287_v41 = vpop.permute.xlu0 %1580 }
 0x26d   :  { %1604 = vset.pattern.permute.xlu0 %v1796_v61  ;;  %v2289_v61 = vpop.permute.xlu1 %1585  ;;  %v2292_v32 = vpop.permute.xlu0 %1590 }
 0x271   :  { %v2294_v39 = vpop.permute.xlu1 %1595 }
 0x288   :  { %899 = vmax.xlane.f32.xlu0 %v2214_v20 }
 0x2a0   :  { %v534_v22 = vpop.xlane.xlu0 %533 }
 0x2a1   :  { %v565_v19 = vsub.f32 %v2142_v25, %v534_v22  ;;  %v870_v8 = vpop.xlane.xlu1 %869 }
 0x2a2   :  { %v901_v40 = vsub.f32 %v2145_v15, %v870_v8 }
 0x2a3   :  { %v741_v34 = vsel %vm725_vm1, %v565_v19, 0.0  ;;  %v581_v30 = vmul.f32 1.442695, %v565_v19 }
 0x2a4   :  { %757 = vadd.xlane.f32.xlu1 %v741_v34  ;;  %v1061_v4 = vsel %vm1045_vm2, %v901_v40, 0.0  ;;  %v917_v63 = vmul.f32 1.442695, %v901_v40 }
 0x2a5   :  { %1077 = vadd.xlane.f32.xlu0 %v1061_v4 }
 0x2a6   :  { %1643 = vpow2.f32 %v917_v63 }
 0x2a7   :  { %1645 = vpow2.f32 %v581_v30 }
 0x2ac   :  { %v550_v3 = vpop.xlane.xlu0 %549 }
 0x2ad   :  { %v886_v2 = vpop.xlane.xlu1 %885  ;;  %v2327_v40 = vsub.f32 %v2150_v37, %v550_v3  ;;  %v1551_v3 = vunpack.i.h.bf16 %v2276_v57 }
 0x2ae   :  { %v909_v31 = vsub.f32 %v2153_v42, %v886_v2  ;;  %v1546_v2 = vunpack.i.h.bf16 %v1544_v12 }
 0x2af   :  { %v597_v19 = vmul.f32 1.442695, %v2327_v40  ;;  %vm1056_vm11 = vcmp.eq.f32.partialorder %v2296_v27, %v1551_v3 }
 0x2b0   :  { %v872_v22 = vpop.xlane.xlu0 %871  ;;  %v1069_v25 = vsel %vm1053_vm3, %v909_v31, 0.0  ;;  %vm1054_vm6 = vcmp.eq.f32.partialorder %v2296_v27, %v1546_v2 }
 0x2b1   :  { %v536_v14 = vpop.xlane.xlu1 %535  ;;  %1093 = vadd.xlane.f32.xlu0 %v1069_v25  ;;  %v2307_v33 = vsub.f32 %v2158_v48, %v872_v22  ;;  %v1530_v48 = vunpack.i.l.bf16 %v2268_v53  ;;  %v1531_v25 = vunpack.i.h.bf16 %v2268_v53  ;;  %1647 = vpow2.f32 %v597_v19 }
 0x2b2   :  { %v566_v8 = vsub.f32 %v2161_v1, %v536_v14 }
 0x2b3   :  { %v1062_v14 = vsel %vm1046_vm5, %v2307_v33, 0.0  ;;  %vm1047_vm7 = vcmp.eq.f32.partialorder %v2296_v27, %v1530_v48  ;;  %vm1048_vm9 = vcmp.eq.f32.partialorder %v2296_v27, %v1531_v25 }
 0x2b4   :  { %v888_v34 = vpop.xlane.xlu0 %887  ;;  %v742_v15 = vsel %vm726_vm4, %v566_v8, 0.0 }
 0x2b5   :  { %v552_v4 = vpop.xlane.xlu1 %551  ;;  %759 = vadd.xlane.f32.xlu0 %v742_v15  ;;  %v2311_v9 = vsub.f32 %v2166_v55, %v888_v34 }
 0x2b7   :  { %v1070_v55 = vsel %vm1054_vm6, %v2311_v9, 0.0 }
 0x2b8   :  { %v2313_v42 = vpop.xlane.xlu0 %553 }
 0x2b9   :  { %v538_v1 = vpop.xlane.xlu1 %537  ;;  %1079 = vadd.xlane.f32.xlu0 %v1062_v14 }
 0x2ba   :  { %v2320_v35 = vsub.f32 %v2177_v23, %v538_v1  ;;  %v1550_v23 = vunpack.i.l.bf16 %v2276_v57  ;;  %v933_v57 = vmul.f32 1.442695, %v909_v31 }
 0x2bc   :  { %v2322_v12 = vpop.xlane.xlu0 %539  ;;  %v743_v14 = vsel %vm727_vm8, %v2320_v35, 0.0  ;;  %vm1055_vm10 = vcmp.eq.f32.partialorder %v2296_v27, %v1550_v23  ;;  %1649 = vpow2.f32 %v933_v57  ;;  %v583_v23 = vmul.f32 1.442695, %v566_v8 }
 0x2bd   :  { %v874_v22 = vpop.xlane.xlu1 %873  ;;  %1095 = vadd.xlane.f32.xlu0 %v1070_v55  ;;  %v1535_v55 = vunpack.i.l.bf16 %v2270_v36 }
 0x2be   :  { %v903_v34 = vsub.f32 %v2191_v21, %v874_v22  ;;  %v1644_v22 = vpop.eup %1643  ;;  %1651 = vpow2.f32 %v583_v23 }
 0x2bf   :  { %vm1049_vm12 = vcmp.eq.f32.partialorder %v2296_v27, %v1535_v55  ;;  %v1646_v31 = vpop.eup %1645 }
 0x2c0   :  { %v876_v15 = vpop.xlane.xlu0 %875  ;;  %v1063_v2 = vsel %vm1047_vm7, %v903_v34, 0.0 }
 0x2c1   :  { %v904_v1 = vsub.f32 %v2196_v6, %v876_v15  ;;  %v890_v53 = vpop.xlane.xlu1 %889  ;;  %1081 = vadd.xlane.f32.xlu1 %v1063_v2  ;;  %761 = vadd.xlane.f32.xlu0 %v743_v14 }
 0x2c2   :  { %v2338_v37 = vsub.f32 %v2199_v58, %v890_v53  ;;  %v921_v53 = vmul.f32 1.442695, %v903_v34  ;;  %v1556_v34 = vunpack.i.h.bf16 %v2278_v59 }
 0x2c3   :  { %v1064_v21 = vsel %vm1048_vm9, %v904_v1, 0.0  ;;  %v923_v19 = vmul.f32 1.442695, %v904_v1 }
 0x2c4   :  { %v892_v63 = vpop.xlane.xlu0 %891  ;;  %v1071_v48 = vsel %vm1055_vm10, %v2338_v37, 0.0  ;;  %1653 = vpow2.f32 %v921_v53  ;;  %vm1058_vm14 = vcmp.eq.f32.partialorder %v2296_v27, %v1556_v34  ;;  %v568_v34 = vsub.f32 %v2188_v10, %v2322_v12 }
 0x2c5   :  { %v912_v6 = vsub.f32 %v2204_v18, %v892_v63  ;;  %v2344_v5 = vpop.xlane.xlu1 %555  ;;  %1097 = vadd.xlane.f32.xlu1 %v1071_v48  ;;  %1083 = vadd.xlane.f32.xlu0 %v1064_v21  ;;  %v2351_v18 = vsub.f32 %v2169_v28, %v552_v4  ;;  %v1536_v28 = vunpack.i.h.bf16 %v2270_v36  ;;  %v1648_v4 = vpop.eup %1647  ;;  %v919_v48 = vmul.f32 1.442695, %v2307_v33 }
 0x2c6   :  { %v587_v10 = vmul.f32 1.442695, %v568_v34 }
 0x2c7   :  { %v1072_v58 = vsel %vm1056_vm11, %v912_v6, 0.0  ;;  %v599_v8 = vmul.f32 1.442695, %v2351_v18  ;;  %vm1050_vm13 = vcmp.eq.f32.partialorder %v2296_v27, %v1536_v28  ;;  %v939_v36 = vmul.f32 1.442695, %v912_v6 }
 0x2c8   :  { %v2348_v25 = vpop.xlane.xlu0 %541  ;;  %v585_v28 = vmul.f32 1.442695, %v2320_v35 }
 0x2c9   :  { %v878_v30 = vpop.xlane.xlu1 %877  ;;  %1099 = vadd.xlane.f32.xlu1 %v1072_v58  ;;  %949 = vadd.xlane.f32.xlu0 %v1644_v22  ;;  %1655 = vpow2.f32 %v599_v8  ;;  %v1650_v58 = vpop.eup %1649 }
 0x2ca   :  { %v2354_v15 = vsub.f32 %v2221_v43, %v878_v30  ;;  %1657 = vpow2.f32 %v923_v19  ;;  %v1652_v30 = vpop.eup %1651 }
 0x2cb   :  { %1659 = vpow2.f32 %v919_v48 }
 0x2cc   :  { %v2357_v2 = vpop.xlane.xlu0 %557  ;;  %v1065_v14 = vsel %vm1049_vm12, %v2354_v15, 0.0  ;;  %1661 = vpow2.f32 %v939_v36 }
 0x2cd   :  { %v2360_v3 = vpop.xlane.xlu1 %893  ;;  %613 = vadd.xlane.f32.xlu1 %v1646_v31  ;;  %1085 = vadd.xlane.f32.xlu0 %v1065_v14 }
 0x2ce   :  { %v1654_v31 = vpop.eup %1653 }
 0x2d0   :  { %v880_v43 = vpop.xlane.xlu0 %879 }
 0x2d1   :  { %v906_v21 = vsub.f32 %v2234_v24, %v880_v43  ;;  %v544_v63 = vpop.xlane.xlu1 %543  ;;  %629 = vadd.xlane.f32.xlu1 %v1648_v4  ;;  %v935_v24 = vmul.f32 1.442695, %v2311_v9 }
 0x2d2   :  { %v2379_v6 = vsub.f32 %v2237_v0, %v544_v63  ;;  %v1541_v0 = vunpack.i.h.bf16 %v2274_v7 }
 0x2d3   :  { %v1066_v57 = vsel %vm1050_vm13, %v906_v21, 0.0  ;;  %1663 = vpow2.f32 %v935_v24  ;;  %v1656_v14 = vpop.eup %1655  ;;  %v927_v63 = vmul.f32 1.442695, %v906_v21  ;;  %v913_v21 = vsub.f32 %v2229_v51, %v2360_v3 }
 0x2d4   :  { %v896_v55 = vpop.xlane.xlu0 %895  ;;  %1087 = vadd.xlane.f32.xlu0 %v1066_v57  ;;  %v591_v9 = vmul.f32 1.442695, %v2379_v6  ;;  %v1658_v4 = vpop.eup %1657  ;;  %v937_v57 = vmul.f32 1.442695, %v2338_v37  ;;  %vm1052_vm15 = vcmp.eq.f32.partialorder %v2296_v27, %v1541_v0 }
 0x2d5   :  { %v2369_v22 = vsub.f32 %v2242_v52, %v896_v55  ;;  %v2371_v1 = vpop.xlane.xlu1 %559  ;;  %965 = vadd.xlane.f32.xlu1 %v1650_v58  ;;  %v1660_v43 = vpop.eup %1659  ;;  %v1555_v55 = vunpack.i.l.bf16 %v2278_v59 }
 0x2d6   :  { %1665 = vpow2.f32 %v591_v9  ;;  %v1662_v35 = vpop.eup %1661 }
 0x2d7   :  { %v1074_v33 = vsel %vm1058_vm14, %v2369_v22, 0.0  ;;  %1667 = vpow2.f32 %v585_v28  ;;  %vm1057_vm0 = vcmp.eq.f32.partialorder %v2296_v27, %v1555_v55 }
 0x2d8   :  { %v2376_v23 = vpop.xlane.xlu0 %545  ;;  %1103 = vadd.xlane.f32.xlu0 %v1074_v33  ;;  %1669 = vpow2.f32 %v927_v63  ;;  %v1560_v63 = vunpack.i.l.bf16 %v2280_v60 }
 0x2d9   :  { %v882_v52 = vpop.xlane.xlu1 %881  ;;  %615 = vadd.xlane.f32.xlu1 %v1652_v30  ;;  %1671 = vpow2.f32 %v937_v57 }
 0x2da   :  { %vm1059_vm4 = vcmp.eq.f32.partialorder %v2296_v27, %v1560_v63 }
 0x2dc   :  { %v562_v53 = vpop.xlane.xlu0 %561  ;;  %953 = vadd.xlane.f32.xlu0 %v1654_v31 }
 0x2dd   :  { %v898_v8 = vpop.xlane.xlu1 %897  ;;  %631 = vadd.xlane.f32.xlu1 %v1656_v14  ;;  %v1664_v24 = vpop.eup %1663  ;;  %v2401_v37 = vsub.f32 %v2258_v29, %v562_v53  ;;  %v1540_v53 = vunpack.i.l.bf16 %v2274_v7 }
 0x2df   :  { %vm1051_vm2 = vcmp.eq.f32.partialorder %v2296_v27, %v1540_v53  ;;  %v1588_v53 = vunpack.i.h.bf16 %v2289_v61 }
 0x2e0   :  { %v884_v19 = vpop.xlane.xlu0 %883  ;;  %955 = vadd.xlane.f32.xlu0 %v1658_v4  ;;  %v1666_v3 = vpop.eup %1665 }
 0x2e1   :  { %v548_v48 = vpop.xlane.xlu1 %547  ;;  %951 = vadd.xlane.f32.xlu1 %v1660_v43  ;;  %v908_v36 = vsub.f32 %v2184_v11, %v884_v19  ;;  %v1073_v11 = vsel %vm1057_vm0, %v913_v21, 0.0  ;;  %v1668_v31 = vpop.eup %1667  ;;  %v907_v43 = vsub.f32 %v2253_v49, %v882_v52  ;;  %v1573_v19 = vunpack.i.h.bf16 %v2283_v47 }
 0x2e2   :  { %v2388_v58 = vsub.f32 %v2180_v44, %v548_v48  ;;  %v1670_v9 = vpop.eup %1669  ;;  %v915_v48 = vsub.f32 %v2261_v17, %v898_v8  ;;  %v569_v49 = vsub.f32 %v2218_v38, %v2348_v25  ;;  %v1578_v52 = vunpack.i.h.bf16 %v2285_v16 }
 0x2e3   :  { %v1068_v44 = vsel %vm1052_vm15, %v908_v36, 0.0  ;;  %v931_v59 = vmul.f32 1.442695, %v908_v36  ;;  %v1672_v28 = vpop.eup %1671  ;;  %v1067_v57 = vsel %vm1051_vm2, %v907_v43, 0.0  ;;  %vm728_vm3 = vcmp.eq.f32.partialorder %v2296_v27, %v1573_v19 }
 0x2e4   :  { %971 = vadd.xlane.f32.xlu0 %v1662_v35  ;;  %v595_v33 = vmul.f32 1.442695, %v2388_v58  ;;  %v1577_v35 = vunpack.i.l.bf16 %v2285_v16  ;;  %v744_v7 = vsel %vm728_vm3, %v568_v34, 0.0  ;;  %v1075_v47 = vsel %vm1059_vm4, %v915_v48, 0.0 }
 0x2e5   :  { %967 = vadd.xlane.f32.xlu1 %v1664_v24  ;;  %vm730_vm6 = vcmp.eq.f32.partialorder %v2296_v27, %v1578_v52  ;;  %v589_v55 = vmul.f32 1.442695, %v569_v49  ;;  %v925_v38 = vmul.f32 1.442695, %v2354_v15  ;;  %v1561_v25 = vunpack.i.h.bf16 %v2280_v60 }
 0x2e6   :  { %1673 = vpow2.f32 %v595_v33  ;;  %vm729_vm5 = vcmp.eq.f32.partialorder %v2296_v27, %v1577_v35  ;;  %v746_v8 = vsel %vm730_vm6, %v2379_v6, 0.0  ;;  %v941_v34 = vmul.f32 1.442695, %v913_v21 }
 0x2e7   :  { %1675 = vpow2.f32 %v587_v10  ;;  %v745_v17 = vsel %vm729_vm5, %v569_v49, 0.0  ;;  %vm1060_vm7 = vcmp.eq.f32.partialorder %v2296_v27, %v1561_v25  ;;  %v943_v6 = vmul.f32 1.442695, %v2369_v22 }
 0x2e8   :  { %v2397_v12 = vpop.permute.xlu0 %1600  ;;  %1091 = vadd.xlane.f32.xlu0 %v1068_v44  ;;  %1677 = vpow2.f32 %v931_v59  ;;  %v571_v10 = vsub.f32 %v2250_v50, %v2376_v23  ;;  %v2436_v22 = vsub.f32 %v2174_v56, %v2313_v42  ;;  %v945_v50 = vmul.f32 1.442695, %v915_v48 }
 0x2e9   :  { %v1602_v51 = vunpack.i.l.bf16 %v2397_v12  ;;  %1101 = vadd.xlane.f32.xlu1 %v1073_v11  ;;  %1679 = vpow2.f32 %v589_v55  ;;  %v1582_v11 = vunpack.i.l.bf16 %v2287_v41  ;;  %v1583_v23 = vunpack.i.h.bf16 %v2287_v41 }
 0x2ea   :  { %1681 = vpow2.f32 %v925_v38  ;;  %v593_v60 = vmul.f32 1.442695, %v571_v10  ;;  %v1587_v56 = vunpack.i.l.bf16 %v2289_v61  ;;  %vm734_vm11 = vcmp.eq.f32.partialorder %v2296_v27, %v1588_v53 }
 0x2eb   :  { %vm2404_vm1 = vcmp.eq.f32.partialorder %v2296_v27, %v1602_v51  ;;  %1683 = vpow2.f32 %v941_v34  ;;  %vm731_vm8 = vcmp.eq.f32.partialorder %v2296_v27, %v1582_v11  ;;  %vm732_vm9 = vcmp.eq.f32.partialorder %v2296_v27, %v1583_v23 }
 0x2ec   :  { %623 = vadd.xlane.f32.xlu0 %v1666_v3  ;;  %v755_v14 = vsel %vm2404_vm1, %v2401_v37, 0.0  ;;  %v747_v3 = vsel %vm731_vm8, %v571_v10, 0.0  ;;  %v748_v41 = vsel %vm732_vm9, %v2388_v58, 0.0  ;;  %vm733_vm10 = vcmp.eq.f32.partialorder %v2296_v27, %v1587_v56 }
 0x2ed   :  { %617 = vadd.xlane.f32.xlu1 %v1668_v31  ;;  %v601_v31 = vmul.f32 1.442695, %v2436_v22  ;;  %v578_v58 = vsub.f32 %v2245_v54, %v2371_v1  ;;  %v1603_v54 = vunpack.i.h.bf16 %v2397_v12  ;;  %v609_v1 = vmul.f32 1.442695, %v2401_v37 }
 0x2ee   :  { %v1592_v38 = vunpack.i.l.bf16 %v2292_v32  ;;  %vm23_vm1 = vcmask 7168  }
 0x2ef   :  { %v607_v61 = vmul.f32 1.442695, %v578_v58  ;;  %vm740_vm14 = vcmp.eq.f32.partialorder %v2296_v27, %v1603_v54 }
 0x2f0   :  { %959 = vadd.xlane.f32.xlu0 %v1670_v9  ;;  %v1674_v29 = vpop.eup %1673  ;;  %v2443_v9 = vsub.f32 %v2207_v26, %v2344_v5  ;;  %v749_v5 = vsel %vm733_vm10, %v2327_v40, 0.0  ;;  %v1598_v40 = vunpack.i.h.bf16 %v2294_v39  ;;  %vm735_vm15 = vcmp.eq.f32.partialorder %v2296_v27, %v1592_v38 }
 0x2f1   :  { %969 = vadd.xlane.f32.xlu1 %v1672_v28  ;;  %v1676_v4 = vpop.eup %1675 }
 0x2f2   :  { %v1678_v0 = vpop.eup %1677  ;;  %v603_v28 = vmul.f32 1.442695, %v2443_v9  ;;  %vm738_vm13 = vcmp.eq.f32.partialorder %v2296_v27, %v1598_v40 }
 0x2f3   :  { %v1680_v15 = vpop.eup %1679  ;;  %v754_v35 = vsel %vm738_vm13, %v578_v58, 0.0 }
 0x2f4   :  { %627 = vadd.xlane.f32.xlu0 %v1674_v29  ;;  %v1682_v21 = vpop.eup %1681  ;;  %v577_v29 = vsub.f32 %v2226_v46, %v2357_v2  ;;  %v750_v46 = vsel %vm734_vm11, %v2351_v18, 0.0  ;;  %v564_v2 = vpop.xlane.xlu1 %563 }
 0x2f5   :  { %619 = vadd.xlane.f32.xlu1 %v1676_v4  ;;  %v1684_v44 = vpop.eup %1683  ;;  %v580_v18 = vsub.f32 %v2210_v45, %v564_v2 }
 0x2f6   :  { %v605_v4 = vmul.f32 1.442695, %v577_v29 }
 0x2f8   :  { %963 = vadd.xlane.f32.xlu0 %v1678_v0 }
 0x2f9   :  { %1089 = vadd.xlane.f32.xlu1 %v1067_v57 }
 0x2fc   :  { %763 = vadd.xlane.f32.xlu0 %v744_v7  ;;  %v756_v7 = vsel %vm740_vm14, %v580_v18, 0.0 }
 0x2fd   :  { %1105 = vadd.xlane.f32.xlu1 %v1075_v47 }
 0x300   :  { %765 = vadd.xlane.f32.xlu0 %v745_v17 }
 0x304   :  { %767 = vadd.xlane.f32.xlu0 %v746_v8 }
 0x315   :  { %v900_v36 = vpop.xlane.xlu0 %899 }
 0x316   :  { %v916_v16 = vsub.f32 %v2214_v20, %v900_v36  ;;  %v929_v20 = vmul.f32 1.442695, %v907_v43  ;;  %v1597_v43 = vunpack.i.l.bf16 %v2294_v39  ;;  %v611_v39 = vmul.f32 1.442695, %v580_v18 }
 0x318   :  { %v947_v24 = vmul.f32 1.442695, %v916_v16  ;;  %v1076_v33 = vsel %vm1060_vm7, %v916_v16, 0.0  ;;  %vm737_vm12 = vcmp.eq.f32.partialorder %v2296_v27, %v1597_v43  ;;  %v1593_v16 = vunpack.i.h.bf16 %v2292_v32 }
 0x319   :  { %1107 = vadd.xlane.f32.xlu1 %v1076_v33  ;;  %v753_v63 = vsel %vm737_vm12, %v577_v29, 0.0 }
 0x31a   :  { %1685 = vpow2.f32 %v947_v24  ;;  %v751_v24 = vsel %vm735_vm15, %v2436_v22, 0.0  ;;  %vm736_vm0 = vcmp.eq.f32.partialorder %v2296_v27, %v1593_v16 }
 0x31b   :  { %1687 = vpow2.f32 %v943_v6  ;;  %v752_v10 = vsel %vm736_vm0, %v2443_v9, 0.0 }
 0x31c   :  { %1689 = vpow2.f32 %v593_v60 }
 0x31d   :  { %621 = vadd.xlane.f32.xlu1 %v1680_v15  ;;  %1691 = vpow2.f32 %v929_v20 }
 0x31e   :  { %1693 = vpow2.f32 %v945_v50 }
 0x31f   :  { %1695 = vpow2.f32 %v601_v31 }
 0x320   :  { %1697 = vpow2.f32 %v603_v28 }
 0x321   :  { %957 = vadd.xlane.f32.xlu1 %v1682_v21  ;;  %1699 = vpow2.f32 %v605_v4 }
 0x322   :  { %1701 = vpow2.f32 %v607_v61 }
 0x323   :  { %1703 = vpow2.f32 %v609_v1 }
 0x324   :  { %v1686_v59 = vpop.eup %1685  ;;  %1705 = vpow2.f32 %v611_v39 }
 0x325   :  { %973 = vadd.xlane.f32.xlu1 %v1684_v44  ;;  %979 = vadd.xlane.f32.xlu0 %v1686_v59  ;;  %v1688_v51 = vpop.eup %1687 }
 0x326   :  { %v1690_v42 = vpop.eup %1689 }
 0x327   :  { %v1692_v26 = vpop.eup %1691 }
 0x328   :  { %v1694_v19 = vpop.eup %1693 }
 0x329   :  { %975 = vadd.xlane.f32.xlu1 %v1688_v51  ;;  %769 = vadd.xlane.f32.xlu0 %v747_v3  ;;  %v1696_v0 = vpop.eup %1695 }
 0x32a   :  { %v1698_v57 = vpop.eup %1697 }
 0x32b   :  { %v1700_v12 = vpop.eup %1699 }
 0x32c   :  { %v1702_v45 = vpop.eup %1701 }
 0x32d   :  { %625 = vadd.xlane.f32.xlu1 %v1690_v42  ;;  %771 = vadd.xlane.f32.xlu0 %v748_v41  ;;  %v1704_v17 = vpop.eup %1703 }
 0x32e   :  { %v1706_v25 = vpop.eup %1705 }
 0x331   :  { %961 = vadd.xlane.f32.xlu1 %v1692_v26  ;;  %773 = vadd.xlane.f32.xlu0 %v749_v5  ;;  %v2472_v8 = vpop.xlane.xlu1 %757 }
 0x332   :  { %v1078_v48 = vpop.xlane.xlu0 %1077 }
 0x335   :  { %977 = vadd.xlane.f32.xlu1 %v1694_v19  ;;  %775 = vadd.xlane.f32.xlu0 %v750_v46 }
 0x339   :  { %633 = vadd.xlane.f32.xlu1 %v1696_v0  ;;  %781 = vadd.xlane.f32.xlu0 %v753_v63 }
 0x33d   :  { %635 = vadd.xlane.f32.xlu1 %v1698_v57  ;;  %783 = vadd.xlane.f32.xlu0 %v754_v35 }
 0x33e   :  { %v2466_v49 = vpop.xlane.xlu0 %1093 }
 0x341   :  { %637 = vadd.xlane.f32.xlu1 %v1700_v12  ;;  %787 = vadd.xlane.f32.xlu0 %v756_v7  ;;  %v2833_v12 = vld [vmem:[#allocation6_spill] sm:$0xff] }
 0x342   :  { %v2468_v47 = vpop.xlane.xlu0 %759 }
 0x345   :  { %639 = vadd.xlane.f32.xlu1 %v1702_v45 }
 0x346   :  { %v2470_v52 = vpop.xlane.xlu0 %1079 }
 0x349   :  { %641 = vadd.xlane.f32.xlu1 %v1704_v17 }
 0x34a   :  { %v2474_v55 = vpop.xlane.xlu0 %1095 }
 0x34d   :  { %643 = vadd.xlane.f32.xlu1 %v1706_v25 }
 0x34e   :  { %v1082_v34 = vpop.xlane.xlu1 %1081  ;;  %v2477_v36 = vpop.xlane.xlu0 %761 }
 0x351   :  { %777 = vadd.xlane.f32.xlu1 %v751_v24 }
 0x352   :  { %v2482_v33 = vpop.xlane.xlu1 %1097  ;;  %v1084_v6 = vpop.xlane.xlu0 %1083 }
 0x355   :  { %779 = vadd.xlane.f32.xlu1 %v752_v10 }
 0x356   :  { %v2486_v15 = vpop.xlane.xlu1 %1099  ;;  %v950_v60 = vpop.xlane.xlu0 %949 }
 0x357   :  { %1707 = vlog2.f32 %v950_v60 }
 0x359   :  { %785 = vadd.xlane.f32.xlu1 %v755_v14 }
 0x35a   :  { %v2492_v32 = vpop.xlane.xlu1 %613  ;;  %v2494_v21 = vpop.xlane.xlu0 %1085 }
 0x35e   :  { %v2496_v20 = vpop.xlane.xlu1 %629 }
 0x361   :  { %v1708_v44 = vpop.eup %1707  ;;  %v2498_v27 = vpop.xlane.xlu0 %1087 }
 0x362   :  { %v1110_v11 = vmul.f32 0.6931472, %v1708_v44  ;;  %v966_v59 = vpop.xlane.xlu1 %965 }
 0x363   :  { %1709 = vlog2.f32 %v966_v59 }
 0x364   :  { %v1141_v22 = vsub.f32 %v1110_v11, %v1078_v48  ;;  %v2832_v48 = vld [vmem:[#allocation11_spill] sm:$0xff] }
 0x365   :  { %v2500_v50 = vpop.xlane.xlu0 %1103 }
 0x366   :  { %v1157_v30 = vmul.f32 %v2057_v13, %v1141_v22  ;;  %v616_v23 = vpop.xlane.xlu1 %615 }
 0x367   :  { %1711 = vlog2.f32 %v616_v23 }
 0x368   :  { %1189 = vrot.lane.b32.xlu0 %v1157_v30, %s1797_s2 }
 0x369   :  { %v954_v37 = vpop.xlane.xlu0 %953 }
 0x36a   :  { %1713 = vlog2.f32 %v954_v37  ;;  %v2504_v14 = vpop.xlane.xlu1 %631 }
 0x36d   :  { %v1710_v51 = vpop.eup %1709  ;;  %v956_v3 = vpop.xlane.xlu0 %955 }
 0x36e   :  { %v2506_v31 = vmul.f32 0.6931472, %v1710_v51  ;;  %1715 = vlog2.f32 %v956_v3  ;;  %v952_v9 = vpop.xlane.xlu1 %951 }
 0x36f   :  { %1717 = vlog2.f32 %v952_v9 }
 0x370   :  { %v1149_v56 = vsub.f32 %v2506_v31, %v2466_v49  ;;  %v1798_v49 = vmov 0.0  }
 0x371   :  { %v1712_v42 = vpop.eup %1711  ;;  %v2510_v41 = vpop.xlane.xlu0 %971  ;;  %24 = vst.msk [vmem:[#allocation2] sm:$0xff] %vm23_vm1, %v1798_v49  ;;  %25 = vst.msk [vmem:[#allocation2 + $0x8] sm:$0xff] %vm23_vm1, %v1798_v49 }
 0x372   :  { %v2512_v28 = vmul.f32 0.6931472, %v1712_v42  ;;  %v2514_v29 = vpop.xlane.xlu1 %967  ;;  %26 = vst.msk [vmem:[#allocation2 + $0x10] sm:$0xff] %vm23_vm1, %v1798_v49  ;;  %27 = vst.msk [vmem:[#allocation2 + $0x18] sm:$0xff] %vm23_vm1, %v1798_v49 }
 0x373   :  { %28 = vst.msk [vmem:[#allocation2 + $0x20] sm:$0xff] %vm23_vm1, %v1798_v49  ;;  %29 = vst.msk [vmem:[#allocation2 + $0x28] sm:$0xff] %vm23_vm1, %v1798_v49 }
 0x374   :  { %v1714_v53 = vpop.eup %1713  ;;  %v822_v26 = vsub.f32 %v2512_v28, %v2468_v47  ;;  %30 = vst.msk [vmem:[#allocation2 + $0x30] sm:$0xff] %vm23_vm1, %v1798_v49  ;;  %31 = vst.msk [vmem:[#allocation2 + $0x38] sm:$0xff] %vm23_vm1, %v1798_v49 }
 0x375   :  { %v1114_v5 = vmul.f32 0.6931472, %v1714_v53  ;;  %v2518_v4 = vpop.xlane.xlu0 %1091  ;;  %32 = vst.msk [vmem:[#allocation2 + $0x40] sm:$0xff] %vm23_vm1, %v1798_v49  ;;  %33 = vst.msk [vmem:[#allocation2 + $0x48] sm:$0xff] %vm23_vm1, %v1798_v49 }
 0x376   :  { %v2520_v58 = vpop.xlane.xlu1 %1101  ;;  %34 = vst.msk [vmem:[#allocation2 + $0x50] sm:$0xff] %vm23_vm1, %v1798_v49  ;;  %35 = vst.msk [vmem:[#allocation2 + $0x58] sm:$0xff] %vm23_vm1, %v1798_v49 }
 0x377   :  { %v1143_v43 = vsub.f32 %v1114_v5, %v1082_v34  ;;  %36 = vst.msk [vmem:[#allocation2 + $0x60] sm:$0xff] %vm23_vm1, %v1798_v49  ;;  %37 = vst.msk [vmem:[#allocation2 + $0x68] sm:$0xff] %vm23_vm1, %v1798_v49 }
 0x378   :  { %v1716_v19 = vpop.eup %1715  ;;  %38 = vst.msk [vmem:[#allocation2 + $0x70] sm:$0xff] %vm23_vm1, %v1798_v49  ;;  %39 = vst.msk [vmem:[#allocation2 + $0x78] sm:$0xff] %vm23_vm1, %v1798_v49 }
 0x379   :  { %v1718_v46 = vpop.eup %1717  ;;  %v1159_v61 = vmul.f32 %v2031_v62, %v1143_v43  ;;  %v624_v40 = vpop.xlane.xlu0 %623  ;;  %v1116_v2 = vmul.f32 0.6931472, %v1716_v19 }
 0x37a   :  { %v1112_v0 = vmul.f32 0.6931472, %v1718_v46  ;;  %v618_v63 = vpop.xlane.xlu1 %617 }
 0x37b   :  { %1719 = vlog2.f32 %v618_v63  ;;  %1193 = vrot.lane.b32.xlu0 %v1159_v61, %s1797_s2  ;;  %v1144_v18 = vsub.f32 %v1116_v2, %v1084_v6 }
 0x37c   :  { %v1142_v54 = vsub.f32 %v1112_v0, %v2470_v52  ;;  %1721 = vlog2.f32 %v624_v40 }
 0x37d   :  { %v960_v1 = vpop.xlane.xlu0 %959  ;;  %v1160_v7 = vmul.f32 %v2833_v12, %v1144_v18 }
 0x37e   :  { %v1158_v57 = vmul.f32 %v2832_v48, %v1142_v54  ;;  %v2526_v35 = vpop.xlane.xlu1 %969 }
 0x380   :  { %1191 = vrot.lane.b32.xlu1 %v1158_v57, %s1797_s2 }
 0x381   :  { %v628_v39 = vpop.xlane.xlu0 %627 }
 0x382   :  { %v620_v45 = vpop.xlane.xlu1 %619 }
 0x383   :  { %1723 = vlog2.f32 %v620_v45 }
 0x384   :  { %1195 = vrot.lane.b32.xlu1 %v1160_v7, %s1797_s2 }
 0x385   :  { %v1720_v17 = vpop.eup %1719  ;;  %v964_v38 = vpop.xlane.xlu0 %963 }
 0x386   :  { %v2531_v25 = vmul.f32 0.6931472, %v1720_v17  ;;  %v1722_v16 = vpop.eup %1721  ;;  %v2549_v22 = vpop.xlane.xlu1 %1089 }
 0x387   :  { %v2543_v44 = vmul.f32 0.6931472, %v1722_v16 }
 0x388   :  { %v823_v52 = vsub.f32 %v2531_v25, %v2477_v36 }
 0x389   :  { %v2535_v34 = vpop.xlane.xlu0 %763 }
 0x38a   :  { %v2551_v30 = vpop.xlane.xlu1 %1105 }
 0x38d   :  { %v1724_v24 = vpop.eup %1723  ;;  %v2537_v6 = vpop.xlane.xlu0 %765 }
 0x38e   :  { %v2539_v10 = vmul.f32 0.6931472, %v1724_v24 }
 0x390   :  { %v824_v60 = vsub.f32 %v2539_v10, %v2535_v34 }
 0x391   :  { %v2545_v11 = vpop.xlane.xlu0 %767 }
 0x392   :  { %v826_v59 = vsub.f32 %v2543_v44, %v2545_v11  ;;  %v840_v36 = vmul.f32 %v2833_v12, %v824_v60 }
 0x3a6   :  { %v2553_v23 = vpop.xlane.xlu1 %1107 }
 0x3aa   :  { %v622_v37 = vpop.xlane.xlu1 %621 }
 0x3ab   :  { %1725 = vlog2.f32 %v622_v37 }
 0x3ac   :  { %1727 = vlog2.f32 %v628_v39 }
 0x3ad   :  { %1729 = vlog2.f32 %v960_v1 }
 0x3ae   :  { %v958_v51 = vpop.xlane.xlu1 %957 }
 0x3af   :  { %1731 = vlog2.f32 %v958_v51 }
 0x3b0   :  { %1733 = vlog2.f32 %v2496_v20 }
 0x3b1   :  { %1735 = vlog2.f32 %v964_v38  ;;  %v2834_v38 = vld [vmem:[#allocation7_spill] sm:$0xff] }
 0x3b2   :  { %v974_v3 = vpop.xlane.xlu1 %973  ;;  %v980_v9 = vpop.xlane.xlu0 %979  ;;  %1737 = vlog2.f32 %v2504_v14 }
 0x3b5   :  { %v1726_v42 = vpop.eup %1725 }
 0x3b6   :  { %v1728_v53 = vpop.eup %1727  ;;  %v2557_v5 = vmul.f32 0.6931472, %v1726_v42  ;;  %v976_v43 = vpop.xlane.xlu1 %975  ;;  %v2835_v42 = vld [vmem:[#allocation8_spill] sm:$0xff] }
 0x3b7   :  { %v2559_v19 = vpop.xlane.xlu0 %769  ;;  %v1730_v46 = vpop.eup %1729  ;;  %1739 = vlog2.f32 %v976_v43  ;;  %v2563_v20 = vmul.f32 0.6931472, %v1728_v53 }
 0x3b8   :  { %v825_v61 = vsub.f32 %v2557_v5, %v2537_v6  ;;  %1741 = vlog2.f32 %v980_v9  ;;  %v1120_v0 = vmul.f32 0.6931472, %v1730_v46 }
 0x3b9   :  { %v1732_v40 = vpop.eup %1731 }
 0x3ba   :  { %v1734_v2 = vpop.eup %1733  ;;  %v1118_v63 = vmul.f32 0.6931472, %v1732_v40  ;;  %v626_v14 = vpop.xlane.xlu1 %625  ;;  %v1146_v45 = vsub.f32 %v1120_v0, %v2498_v27  ;;  %v841_v47 = vmul.f32 %v2834_v38, %v825_v61 }
 0x3bb   :  { %v2565_v54 = vpop.xlane.xlu0 %771  ;;  %v1736_v1 = vpop.eup %1735  ;;  %1743 = vlog2.f32 %v626_v14  ;;  %v2570_v39 = vmul.f32 0.6931472, %v1734_v2 }
 0x3bc   :  { %v828_v18 = vsub.f32 %v2563_v20, %v2565_v54  ;;  %v1145_v57 = vsub.f32 %v1118_v63, %v2494_v21  ;;  %v1738_v7 = vpop.eup %1737  ;;  %v1124_v17 = vmul.f32 0.6931472, %v1736_v1  ;;  %v1162_v53 = vmul.f32 %v2835_v42, %v1146_v45 }
 0x3bd   :  { %v2580_v21 = vmul.f32 0.6931472, %v1738_v7 }
 0x3be   :  { %v1161_v16 = vmul.f32 %v2834_v38, %v1145_v57  ;;  %v962_v24 = vpop.xlane.xlu1 %961  ;;  %v1148_v27 = vsub.f32 %v1124_v17, %v2518_v4 }
 0x3bf   :  { %v2574_v37 = vpop.xlane.xlu0 %773  ;;  %1745 = vlog2.f32 %v962_v24  ;;  %v2837_v24 = vld [vmem:[#allocation17_spill] sm:$0xff] }
 0x3c0   :  { %1197 = vrot.lane.b32.xlu0 %v1161_v16, %s1797_s2  ;;  %1747 = vlog2.f32 %v2514_v29  ;;  %v2836_v29 = vld [vmem:[#allocation10_spill] sm:$0xff]  ;;  %v2847_v5 = vsub.f32 %v2570_v39, %v2574_v37 }
 0x3c1   :  { %v1740_v9 = vpop.eup %1739  ;;  %1749 = vlog2.f32 %v2526_v35  ;;  %v1164_v14 = vmul.f32 %v2836_v29, %v1148_v27  ;;  %v844_v34 = vmul.f32 %v2836_v29, %v828_v18 }
 0x3c2   :  { %v1136_v43 = vmul.f32 0.6931472, %v1740_v9  ;;  %v978_v46 = vpop.xlane.xlu1 %977  ;;  %v1742_v2 = vpop.eup %1741  ;;  %1751 = vlog2.f32 %v2510_v41  ;;  %v2840_v41 = vld [vmem:[#allocation12_spill] sm:$0xff] }
 0x3c3   :  { %v2584_v40 = vpop.xlane.xlu0 %775  ;;  %v1140_v1 = vmul.f32 0.6931472, %v1742_v2  ;;  %1753 = vlog2.f32 %v974_v3  ;;  %v2838_v2 = vld [vmem:[#allocation19_spill] sm:$0xff]  ;;  %v845_v61 = vmul.f32 %v2840_v41, %v2847_v5 }
 0x3c4   :  { %1199 = vrot.lane.b32.xlu0 %v1162_v53, %s1797_s2  ;;  %v1154_v57 = vsub.f32 %v1136_v43, %v2500_v50  ;;  %v2848_v18 = vsub.f32 %v2580_v21, %v2584_v40 }
 0x3c5   :  { %v1744_v63 = vpop.eup %1743  ;;  %v1156_v16 = vsub.f32 %v1140_v1, %v2553_v23 }
 0x3c6   :  { %v2592_v7 = vmul.f32 0.6931472, %v1744_v63  ;;  %v634_v4 = vpop.xlane.xlu1 %633  ;;  %v1170_v35 = vmul.f32 %v2837_v24, %v1154_v57 }
 0x3c7   :  { %v1172_v63 = vmul.f32 %v2838_v2, %v1156_v16  ;;  %v2615_v16 = vpop.xlane.xlu0 %781 }
 0x3c8   :  { %1203 = vrot.lane.b32.xlu0 %v1164_v14, %s1797_s2  ;;  %v2839_v14 = vld [vmem:[#allocation9_spill] sm:$0xff]  ;;  %v2846_v60 = vsub.f32 %v2592_v7, %v2559_v19 }
 0x3c9   :  { %v1746_v17 = vpop.eup %1745 }
 0x3ca   :  { %v1122_v9 = vmul.f32 0.6931472, %v1746_v17  ;;  %v636_v53 = vpop.xlane.xlu1 %635  ;;  %v1748_v27 = vpop.eup %1747  ;;  %v843_v44 = vmul.f32 %v2839_v14, %v2846_v60 }
 0x3cb   :  { %v1128_v43 = vmul.f32 0.6931472, %v1748_v27  ;;  %v1750_v45 = vpop.eup %1749 }
 0x3cc   :  { %v1147_v50 = vsub.f32 %v1122_v9, %v2549_v22  ;;  %1215 = vrot.lane.b32.xlu0 %v1170_v35, %s1797_s2  ;;  %v1165_v22 = vmul.f32 %v2840_v41, %v1149_v56  ;;  %v1130_v3 = vmul.f32 0.6931472, %v1750_v45  ;;  %v1752_v57 = vpop.eup %1751  ;;  %v2842_v56 = vld [vmem:[#allocation14_spill] sm:$0xff] }
 0x3cd   :  { %v1150_v23 = vsub.f32 %v1128_v43, %v2474_v55  ;;  %v1754_v17 = vpop.eup %1753 }
 0x3ce   :  { %v1163_v0 = vmul.f32 %v2839_v14, %v1147_v50  ;;  %v638_v51 = vpop.xlane.xlu1 %637  ;;  %v1134_v35 = vmul.f32 0.6931472, %v1754_v17 }
 0x3cf   :  { %1755 = vlog2.f32 %v638_v51  ;;  %v1132_v51 = vmul.f32 0.6931472, %v1752_v57 }
 0x3d0   :  { %1757 = vlog2.f32 %v634_v4  ;;  %1201 = vrot.lane.b32.xlu1 %v1163_v0, %s1797_s2  ;;  %1219 = vrot.lane.b32.xlu0 %v1172_v63, %s1797_s2  ;;  %v2841_v0 = vld [vmem:[#allocation13_spill] sm:$0xff]  ;;  %v1153_v57 = vsub.f32 %v1134_v35, %v2520_v58 }
 0x3d1   :  { %1759 = vlog2.f32 %v978_v46  ;;  %v1166_v4 = vmul.f32 %v2841_v0, %v1150_v23  ;;  %v1151_v46 = vsub.f32 %v1130_v3, %v2482_v33  ;;  %v1152_v31 = vsub.f32 %v1132_v51, %v2486_v15  ;;  %v2843_v3 = vld [vmem:[#allocation15_spill] sm:$0xff] }
 0x3d2   :  { %1761 = vlog2.f32 %v2492_v32  ;;  %v640_v1 = vpop.xlane.xlu1 %639  ;;  %v846_v19 = vmul.f32 %v2841_v0, %v2848_v18 }
 0x3d3   :  { %1763 = vlog2.f32 %v640_v1  ;;  %v1167_v45 = vmul.f32 %v2842_v56, %v1151_v46  ;;  %v1168_v1 = vmul.f32 %v2843_v3, %v1152_v31  ;;  %v2844_v31 = vld [vmem:[#allocation16_spill] sm:$0xff] }
 0x3d4   :  { %1765 = vlog2.f32 %v636_v53  ;;  %1205 = vrot.lane.b32.xlu1 %v1165_v22, %s1797_s2  ;;  %v2641_v22 = vpop.xlane.xlu0 %783 }
 0x3d6   :  { %v642_v32 = vpop.xlane.xlu1 %641 }
 0x3d7   :  { %1767 = vlog2.f32 %v642_v32 }
 0x3d8   :  { %1207 = vrot.lane.b32.xlu1 %v1166_v4, %s1797_s2 }
 0x3d9   :  { %v1756_v55 = vpop.eup %1755 }
 0x3da   :  { %v1758_v33 = vpop.eup %1757  ;;  %v2636_v9 = vmul.f32 0.6931472, %v1756_v55  ;;  %v644_v53 = vpop.xlane.xlu1 %643 }
 0x3db   :  { %v1760_v27 = vpop.eup %1759  ;;  %1769 = vlog2.f32 %v644_v53  ;;  %v2643_v23 = vmul.f32 0.6931472, %v1758_v33  ;;  %v2660_v53 = vpop.xlane.xlu0 %787 }
 0x3dc   :  { %v1762_v50 = vpop.eup %1761  ;;  %1209 = vrot.lane.b32.xlu1 %v1167_v45, %s1797_s2  ;;  %v1138_v51 = vmul.f32 0.6931472, %v1760_v27  ;;  %v1169_v45 = vmul.f32 %v2844_v31, %v1153_v57  ;;  %v2849_v40 = vsub.f32 %v2636_v9, %v2615_v16 }
 0x3dd   :  { %v1764_v63 = vpop.eup %1763  ;;  %v790_v17 = vmul.f32 0.6931472, %v1762_v50 }
 0x3de   :  { %v1766_v15 = vpop.eup %1765  ;;  %v2647_v4 = vmul.f32 0.6931472, %v1764_v63  ;;  %v2649_v46 = vpop.xlane.xlu1 %777  ;;  %v1155_v58 = vsub.f32 %v1138_v51, %v2551_v30  ;;  %v849_v0 = vmul.f32 %v2844_v31, %v2849_v40  ;;  %v1255_v31 = vld [vmem:[#allocation2 + $0x10] sm:$0xff] }
 0x3df   :  { %v831_v32 = vsub.f32 %v2643_v23, %v2649_v46  ;;  %v2656_v55 = vmul.f32 0.6931472, %v1766_v15  ;;  %v821_v63 = vsub.f32 %v790_v17, %v2472_v8  ;;  %v1190_v57 = vpop.permute.xlu0 %1189 }
 0x3e0   :  { %1211 = vrot.lane.b32.xlu1 %v1168_v1, %s1797_s2  ;;  %v834_v49 = vsub.f32 %v2647_v4, %v2641_v22  ;;  %v2845_v1 = vld [vmem:[#allocation18_spill] sm:$0xff] }
 0x3e1   :  { %v1768_v33 = vpop.eup %1767  ;;  %v1171_v15 = vmul.f32 %v2845_v1, %v1155_v58  ;;  %v837_v51 = vmul.f32 %v2057_v13, %v821_v63  ;;  %v838_v13 = vmul.f32 %v2832_v48, %v822_v26  ;;  %v842_v48 = vmul.f32 %v2835_v42, %v826_v59 }
 0x3e2   :  { %v780_v35 = vpop.xlane.xlu1 %779  ;;  %v2665_v23 = vmul.f32 0.6931472, %v1768_v33  ;;  %v847_v29 = vmul.f32 %v2842_v56, %v831_v32  ;;  %v850_v21 = vmul.f32 %v2837_v24, %v834_v49 }
 0x3e3   :  { %v832_v27 = vsub.f32 %v2656_v55, %v780_v35  ;;  %v1237_v17 = vadd.f32 %v1190_v57, %v837_v51  ;;  %v839_v55 = vmul.f32 %v2031_v62, %v823_v52  ;;  %v1257_v51 = vld [vmem:[#allocation2 + $0x20] sm:$0xff] }
 0x3e4   :  { %1213 = vrot.lane.b32.xlu1 %v1169_v45, %s1797_s2 }
 0x3e5   :  { %v1770_v50 = vpop.eup %1769  ;;  %v848_v39 = vmul.f32 %v2843_v3, %v832_v27  ;;  %v1253_v27 = vld [vmem:[#allocation2] sm:$0xff] }
 0x3e6   :  { %v820_v46 = vmul.f32 0.6931472, %v1770_v50  ;;  %v2668_v43 = vpop.xlane.xlu1 %785 }
 0x3e7   :  { %v835_v30 = vsub.f32 %v2665_v23, %v2668_v43  ;;  %v1254_v23 = vld [vmem:[#allocation2 + $0x8] sm:$0xff] }
 0x3e8   :  { %1217 = vrot.lane.b32.xlu1 %v1171_v15, %s1797_s2  ;;  %v836_v8 = vsub.f32 %v820_v46, %v2660_v53  ;;  %v1256_v46 = vld [vmem:[#allocation2 + $0x18] sm:$0xff] }
 0x3e9   :  { %v851_v22 = vmul.f32 %v2845_v1, %v835_v30 }
 0x3ea   :  { %v852_v3 = vmul.f32 %v2838_v2, %v836_v8 }
 0x3ec   :  { %1301 = vrot.lane.b32.xlu1 %v1237_v17, %s1799_s18 }
 0x3ed   :  { %v1194_v33 = vpop.permute.xlu0 %1193 }
 0x3ee   :  { %v1239_v45 = vadd.f32 %v1194_v33, %v839_v55  ;;  %v1258_v55 = vld [vmem:[#allocation2 + $0x28] sm:$0xff] }
 0x3f0   :  { %1305 = vrot.lane.b32.xlu1 %v1239_v45, %s1799_s18 }
 0x3f2   :  { %v1192_v43 = vpop.permute.xlu1 %1191 }
 0x3f3   :  { %v1238_v58 = vadd.f32 %v1192_v43, %v838_v13  ;;  %v1260_v13 = vld [vmem:[#allocation2 + $0x38] sm:$0xff] }
 0x3f5   :  { %1303 = vrot.lane.b32.xlu0 %v1238_v58, %s1799_s18 }
 0x3f6   :  { %v1196_v25 = vpop.permute.xlu1 %1195 }
 0x3f7   :  { %v1240_v62 = vadd.f32 %v1196_v25, %v840_v36  ;;  %v1259_v25 = vld [vmem:[#allocation2 + $0x30] sm:$0xff] }
 0x3f9   :  { %1307 = vrot.lane.b32.xlu0 %v1240_v62, %s1799_s18 }
 0x432   :  { %v1198_v28 = vpop.permute.xlu0 %1197 }
 0x433   :  { %v1241_v26 = vadd.f32 %v1198_v28, %v841_v47 }
 0x435   :  { %1309 = vrot.lane.b32.xlu1 %v1241_v26, %s1799_s18 }
 0x436   :  { %v1200_v52 = vpop.permute.xlu0 %1199 }
 0x437   :  { %v1242_v12 = vadd.f32 %v1200_v52, %v842_v48  ;;  %v1261_v52 = vld [vmem:[#allocation2 + $0x40] sm:$0xff] }
 0x439   :  { %1311 = vrot.lane.b32.xlu0 %v1242_v12, %s1799_s18 }
 0x43a   :  { %v1204_v6 = vpop.permute.xlu0 %1203 }
 0x43b   :  { %v1244_v10 = vadd.f32 %v1204_v6, %v844_v34 }
 0x43d   :  { %1315 = vrot.lane.b32.xlu0 %v1244_v10, %s1799_s18 }
 0x43e   :  { %v1216_v37 = vpop.permute.xlu0 %1215 }
 0x43f   :  { %v1250_v32 = vadd.f32 %v1216_v37, %v850_v21 }
 0x442   :  { %v1202_v11 = vpop.permute.xlu1 %1201  ;;  %v1220_v63 = vpop.permute.xlu0 %1219 }
 0x443   :  { %v1243_v59 = vadd.f32 %v1202_v11, %v843_v44  ;;  %v1252_v4 = vadd.f32 %v1220_v63, %v852_v3  ;;  %v1262_v11 = vld [vmem:[#allocation2 + $0x48] sm:$0xff] }
 0x444   :  { %v1266_v63 = vld [vmem:[#allocation2 + $0x68] sm:$0xff] }
 0x445   :  { %1313 = vrot.lane.b32.xlu1 %v1243_v59, %s1799_s18 }
 0x446   :  { %v1206_v20 = vpop.permute.xlu1 %1205 }
 0x447   :  { %v1245_v54 = vadd.f32 %v1206_v20, %v845_v61 }
 0x449   :  { %1317 = vrot.lane.b32.xlu1 %v1245_v54, %s1799_s18 }
 0x44a   :  { %v1208_v38 = vpop.permute.xlu1 %1207 }
 0x44b   :  { %v1246_v42 = vadd.f32 %v1208_v38, %v846_v19  ;;  %v1263_v38 = vld [vmem:[#allocation2 + $0x50] sm:$0xff] }
 0x44d   :  { %1319 = vrot.lane.b32.xlu0 %v1246_v42, %s1799_s18 }
 0x44e   :  { %v1210_v7 = vpop.permute.xlu1 %1209 }
 0x44f   :  { %v1247_v14 = vadd.f32 %v1210_v7, %v847_v29 }
 0x451   :  { %1321 = vrot.lane.b32.xlu1 %v1247_v14, %s1799_s18 }
 0x452   :  { %v1212_v41 = vpop.permute.xlu1 %1211 }
 0x453   :  { %v1248_v35 = vadd.f32 %v1212_v41, %v848_v39 }
 0x455   :  { %1323 = vrot.lane.b32.xlu0 %v1248_v35, %s1799_s18  ;;  %v1264_v35 = vld [vmem:[#allocation2 + $0x58] sm:$0xff] }
 0x456   :  { %v1214_v56 = vpop.permute.xlu1 %1213 }
 0x457   :  { %v1249_v53 = vadd.f32 %v1214_v56, %v849_v0 }
 0x459   :  { %1325 = vrot.lane.b32.xlu1 %v1249_v53, %s1799_s18  ;;  %1327 = vrot.lane.b32.xlu0 %v1250_v32, %s1799_s18  ;;  %v1265_v53 = vld [vmem:[#allocation2 + $0x60] sm:$0xff] }
 0x45a   :  { %v1218_v24 = vpop.permute.xlu1 %1217 }
 0x45b   :  { %v1251_v49 = vadd.f32 %v1218_v24, %v851_v22 }
 0x45d   :  { %1329 = vrot.lane.b32.xlu1 %v1251_v49, %s1799_s18  ;;  %1331 = vrot.lane.b32.xlu0 %v1252_v4, %s1799_s18 }
 0x45e   :  { %v1302_v16 = vpop.permute.xlu1 %1301 }
 0x45f   :  { %v1349_v9 = vadd.f32 %v1302_v16, %v1253_v27 }
 0x461   :  { %1366 = vst.msk [vmem:[#allocation2] sm:$0xff] %vm23_vm1, %v1349_v9 }
 0x462   :  { %v1306_v2 = vpop.permute.xlu1 %1305 }
 0x463   :  { %v1351_v50 = vadd.f32 %v1306_v2, %v1255_v31  ;;  %v1267_v2 = vld [vmem:[#allocation2 + $0x70] sm:$0xff] }
 0x465   :  { %1368 = vst.msk [vmem:[#allocation2 + $0x10] sm:$0xff] %vm23_vm1, %v1351_v50  ;;  %v1268_v50 = vld [vmem:[#allocation2 + $0x78] sm:$0xff] }
 0x467   :  { %v1304_v15 = vpop.permute.xlu0 %1303 }
 0x468   :  { %v1350_v1 = vadd.f32 %v1304_v15, %v1254_v23  ;;  %v1385_v62 = vld [vmem:[#allocation2] sm:$0xff] }
 0x469   :  { %v1401_v48 = vsel %vm23_vm1, %v1385_v62, 0.0 }
 0x46a   :  { %1367 = vst.msk [vmem:[#allocation2 + $0x8] sm:$0xff] %vm23_vm1, %v1350_v1 }
 0x46b   :  { %v1308_v57 = vpop.permute.xlu0 %1307 }
 0x46c   :  { %v1352_v30 = vadd.f32 %v1308_v57, %v1256_v46  ;;  %v1387_v12 = vld [vmem:[#allocation2 + $0x10] sm:$0xff] }
 0x46d   :  { %v1404_v44 = vsel %vm23_vm1, %v1387_v12, 0.0 }
 0x46e   :  { %1369 = vst.msk [vmem:[#allocation2 + $0x18] sm:$0xff] %vm23_vm1, %v1352_v30 }
 0x471   :  { %v1386_v36 = vld [vmem:[#allocation2 + $0x8] sm:$0xff] }
 0x472   :  { %v1402_v47 = vsel %vm23_vm1, %v1386_v36, 0.0 }
 0x473   :  { %v1403_v34 = vadd.f32 %v1402_v47, %v1401_v48 }
 0x475   :  { %v1388_v10 = vld [vmem:[#allocation2 + $0x18] sm:$0xff]  ;;  %v1405_v5 = vadd.f32 %v1404_v44, %v1403_v34 }
 0x476   :  { %v1406_v61 = vsel %vm23_vm1, %v1388_v10, 0.0 }
 0x477   :  { %v1407_v29 = vadd.f32 %v1406_v61, %v1405_v5 }
 0x4a7   :  { %v1310_v8 = vpop.permute.xlu1 %1309 }
 0x4a8   :  { %v1353_v17 = vadd.f32 %v1310_v8, %v1257_v51 }
 0x4aa   :  { %1370 = vst.msk [vmem:[#allocation2 + $0x20] sm:$0xff] %vm23_vm1, %v1353_v17 }
 0x4ab   :  { %v1312_v33 = vpop.permute.xlu0 %1311 }
 0x4ac   :  { %v1354_v45 = vadd.f32 %v1312_v33, %v1258_v55 }
 0x4ae   :  { %1371 = vst.msk [vmem:[#allocation2 + $0x28] sm:$0xff] %vm23_vm1, %v1354_v45 }
 0x4af   :  { %v1316_v43 = vpop.permute.xlu0 %1315 }
 0x4b0   :  { %v1356_v58 = vadd.f32 %v1316_v43, %v1260_v13 }
 0x4b1   :  { %v1389_v59 = vld [vmem:[#allocation2 + $0x20] sm:$0xff] }
 0x4b2   :  { %1373 = vst.msk [vmem:[#allocation2 + $0x38] sm:$0xff] %vm23_vm1, %v1356_v58  ;;  %v1408_v19 = vsel %vm23_vm1, %v1389_v59, 0.0 }
 0x4b3   :  { %v1409_v39 = vadd.f32 %v1408_v19, %v1407_v29 }
 0x4b5   :  { %v1390_v54 = vld [vmem:[#allocation2 + $0x28] sm:$0xff] }
 0x4b6   :  { %v1410_v7 = vsel %vm23_vm1, %v1390_v54, 0.0 }
 0x4b7   :  { %v1314_v28 = vpop.permute.xlu1 %1313  ;;  %v1411_v21 = vadd.f32 %v1410_v7, %v1409_v39 }
 0x4b8   :  { %v1355_v26 = vadd.f32 %v1314_v28, %v1259_v25 }
 0x4b9   :  { %v1392_v0 = vld [vmem:[#allocation2 + $0x38] sm:$0xff] }
 0x4ba   :  { %1372 = vst.msk [vmem:[#allocation2 + $0x30] sm:$0xff] %vm23_vm1, %v1355_v26  ;;  %v1414_v22 = vsel %vm23_vm1, %v1392_v0, 0.0 }
 0x4bb   :  { %v1318_v6 = vpop.permute.xlu1 %1317 }
 0x4bc   :  { %v1357_v60 = vadd.f32 %v1318_v6, %v1261_v52 }
 0x4be   :  { %1374 = vst.msk [vmem:[#allocation2 + $0x40] sm:$0xff] %vm23_vm1, %v1357_v60 }
 0x4bf   :  { %v1320_v20 = vpop.permute.xlu0 %1319 }
 0x4c0   :  { %v1358_v18 = vadd.f32 %v1320_v20, %v1262_v11 }
 0x4c1   :  { %v1391_v42 = vld [vmem:[#allocation2 + $0x30] sm:$0xff] }
 0x4c2   :  { %1375 = vst.msk [vmem:[#allocation2 + $0x48] sm:$0xff] %vm23_vm1, %v1358_v18  ;;  %v1412_v41 = vsel %vm23_vm1, %v1391_v42, 0.0 }
 0x4c3   :  { %v1322_v14 = vpop.permute.xlu1 %1321  ;;  %v1413_v56 = vadd.f32 %v1412_v41, %v1411_v21 }
 0x4c4   :  { %v1359_v37 = vadd.f32 %v1322_v14, %v1263_v38 }
 0x4c5   :  { %v1393_v3 = vld [vmem:[#allocation2 + $0x40] sm:$0xff]  ;;  %v1415_v27 = vadd.f32 %v1414_v22, %v1413_v56 }
 0x4c6   :  { %1376 = vst.msk [vmem:[#allocation2 + $0x50] sm:$0xff] %vm23_vm1, %v1359_v37  ;;  %v1416_v31 = vsel %vm23_vm1, %v1393_v3, 0.0 }
 0x4c7   :  { %v1324_v40 = vpop.permute.xlu0 %1323  ;;  %v1417_v57 = vadd.f32 %v1416_v31, %v1415_v27 }
 0x4c8   :  { %v1360_v32 = vadd.f32 %v1324_v40, %v1264_v35 }
 0x4c9   :  { %v1394_v49 = vld [vmem:[#allocation2 + $0x48] sm:$0xff] }
 0x4ca   :  { %1377 = vst.msk [vmem:[#allocation2 + $0x58] sm:$0xff] %vm23_vm1, %v1360_v32  ;;  %v1418_v15 = vsel %vm23_vm1, %v1394_v49, 0.0 }
 0x4cb   :  { %v1326_v24 = vpop.permute.xlu1 %1325  ;;  %v1328_v4 = vpop.permute.xlu0 %1327  ;;  %v1419_v55 = vadd.f32 %v1418_v15, %v1417_v57 }
 0x4cc   :  { %v1361_v16 = vadd.f32 %v1326_v24, %v1265_v53  ;;  %v1362_v9 = vadd.f32 %v1328_v4, %v1266_v63 }
 0x4cd   :  { %v1395_v23 = vld [vmem:[#allocation2 + $0x50] sm:$0xff] }
 0x4ce   :  { %1378 = vst.msk [vmem:[#allocation2 + $0x60] sm:$0xff] %vm23_vm1, %v1361_v16  ;;  %1379 = vst.msk [vmem:[#allocation2 + $0x68] sm:$0xff] %vm23_vm1, %v1362_v9  ;;  %v1420_v8 = vsel %vm23_vm1, %v1395_v23, 0.0 }
 0x4cf   :  { %v1330_v1 = vpop.permute.xlu1 %1329  ;;  %v1332_v46 = vpop.permute.xlu0 %1331  ;;  %v1421_v45 = vadd.f32 %v1420_v8, %v1419_v55 }
 0x4d0   :  { %v1363_v30 = vadd.f32 %v1330_v1, %v1267_v2  ;;  %v1364_v51 = vadd.f32 %v1332_v46, %v1268_v50 }
 0x4d1   :  { %v1396_v17 = vld [vmem:[#allocation2 + $0x58] sm:$0xff] }
 0x4d2   :  { %1380 = vst.msk [vmem:[#allocation2 + $0x70] sm:$0xff] %vm23_vm1, %v1363_v30  ;;  %1381 = vst.msk [vmem:[#allocation2 + $0x78] sm:$0xff] %vm23_vm1, %v1364_v51  ;;  %v1422_v33 = vsel %vm23_vm1, %v1396_v17, 0.0 }
 0x4d3   :  { %v1423_v58 = vadd.f32 %v1422_v33, %v1421_v45 }
 0x4d5   :  { %v1397_v13 = vld [vmem:[#allocation2 + $0x60] sm:$0xff]  ;;  %v1398_v43 = vld [vmem:[#allocation2 + $0x68] sm:$0xff] }
 0x4d6   :  { %v1424_v36 = vsel %vm23_vm1, %v1397_v13, 0.0  ;;  %v1426_v62 = vsel %vm23_vm1, %v1398_v43, 0.0 }
 0x4d7   :  { %v1425_v25 = vadd.f32 %v1424_v36, %v1423_v58 }
 0x4d9   :  { %v1399_v47 = vld [vmem:[#allocation2 + $0x70] sm:$0xff]  ;;  %v1400_v28 = vld [vmem:[#allocation2 + $0x78] sm:$0xff]  ;;  %v1427_v26 = vadd.f32 %v1426_v62, %v1425_v25 }
 0x4da   :  { %v1428_v48 = vsel %vm23_vm1, %v1399_v47, 0.0  ;;  %v1430_v12 = vsel %vm23_vm1, %v1400_v28, 0.0 }
 0x4db   :  { %v1429_v52 = vadd.f32 %v1428_v48, %v1427_v26 }
 0x4dd   :  { %v1431_v34 = vadd.f32 %v1430_v12, %v1429_v52 }
 0x4df   :  { %1432 = vadd.xlane.f32.xlu1 %v1431_v34 }
 0x56c   :  { %v1433_v6 = vpop.xlane.xlu1 %1432 }
 0x56d   :  { %v1434_v10 = vrot.slane %v1433_v6, 4 }
 0x56f   :  { %v1435_v60 = vadd.f32 %v1434_v10, %v1433_v6 }
 0x571   :  { %v1436_v44 = vrot.slane %v1435_v60, 2 }
 0x573   :  { %v1437_v11 = vadd.f32 %v1436_v44, %v1435_v60 }
 0x575   :  { %v1438_v59 = vrot.slane %v1437_v11, 1 }
 0x577   :  { %v1439_v5 = vadd.f32 %v1438_v59, %v1437_v11 }
 0x579   :  { %1512 = vpush %v1439_v5 }
 0x5aa   :  { %s1513_s0 = spop %1512 }
 0x5ab   :  { %v1441_v61 = vstv %s1513_s0 }
 0x5ac   :  { %1442 = vst [vmem:[#allocation3] sm:$0xff] %v1441_v61 }
 0x5ad   :  { %1782 = shalt.err (!%p1779_p4)
}
 0x5ae   :  { %s1783_s24 = scalar_lea.hbm %s2787_s4, 128 }
 0x5af   :  { %p1784_p5 = scmp.ne.s32.totalorder %s2787_s4, %s1783_s24  ;;  %p1787_p6 = scmp.lt.u32.totalorder %s1783_s24, %s2787_s4 }
 0x5b1   :  { %p1789_p7 = pnand %p1787_p6, %p1784_p5 }
 0x5b3   :  { %1792 = shalt.err (!%p1789_p7)
}
 0x5b4   :  { %1452 = dma.vmem_to_hbm [thread:$0]  %s1450_s20, 128, %s2787_s4, [#allocation4]  }
 0x5b5   :  { %1793 = dma.done.wait [#allocation4], 128  }
 0x5b6   :  { %1794 = vsyncadd [#allocation4], 4294967168 }
 0x5b7   :  { %1456 = vsyncpa [#allocation4], 1 }

</bundles_post_ra>
